<compile_context>
chip_gen: v6e
topology: v6e:2x2x1
jax: 0.10.0
libtpu: 0.0.40
codegen_flags: <defaults>
</compile_context>

<pallas_src>
import functools

import jax
import jax.numpy as jnp
from jax.experimental import pallas as pl
from jax.experimental.pallas import tpu as pltpu  # noqa: F401  (TPU backend assumed)

# ----------------------- small RoBERTa-like config -----------------------
VOCAB = 128
HIDDEN = 32
N_HEADS = 2
HEAD_DIM = HIDDEN // N_HEADS
N_LAYERS = 2
INTERMEDIATE = 64
MAX_POS = 32
EPS = 1e-5

BATCH = 2
SEQ = 8


# --------------------------- fused Pallas kernel ---------------------------
def _fused_forward_kernel(
    x_ref,        # [B*S, H]   embedding sum (pre-LN)
    bias_ref,     # [B, 1, S]  additive attention bias (0 / -1e9)
    onehot_ref,   # [B, B*S]   one-hot prompt-row selector
    emb_g_ref, emb_b_ref,                      # [1, H]
    wqkv_ref, bqkv_ref,                        # [L, H, 3H], [L, 1, 3H]  (wq/bq pre-scaled)
    wo_ref, bo_ref,                            # [L, H, H],  [L, 1, H]
    aln_g_ref, aln_b_ref,                      # [L, 1, H]
    w1_ref, b1_ref,                            # [L, H, I],  [L, 1, I]
    w2_ref, b2_ref,                            # [L, I, H],  [L, 1, H]
    fln_g_ref, fln_b_ref,                      # [L, 1, H]
    wemb_t_ref,                                # [H, V]  (pre-transposed word embeddings)
    o_ref,                                     # [B, V]
    *, b, s,
):
    def layernorm(x, g, beta):
        mu = jnp.mean(x, axis=-1, keepdims=True)
        xc = x - mu
        var = jnp.mean(xc * xc, axis=-1, keepdims=True)
        return xc * jax.lax.rsqrt(var + EPS) * g + beta

    x = layernorm(x_ref[...].astype(jnp.float32), emb_g_ref[...], emb_b_ref[...])
    bias = bias_ref[...]  # [B, 1, S], broadcasts over the query axis

    for li in range(N_LAYERS):
        # ---- fused QKV projection (one MXU matmul, N = 3*HIDDEN) ----
        qkv = jnp.dot(x, wqkv_ref[li], preferred_element_type=jnp.float32) + bqkv_ref[li]
        q3 = qkv[:, 0 * HIDDEN:1 * HIDDEN].reshape(b, s, HIDDEN)  # already scaled by 1/sqrt(D)
        k3 = qkv[:, 1 * HIDDEN:2 * HIDDEN].reshape(b, s, HIDDEN)
        v3 = qkv[:, 2 * HIDDEN:3 * HIDDEN].reshape(b, s, HIDDEN)

        # ---- per-head attention, everything stays in vregs/VMEM ----
        head_ctx = []
        for h in range(N_HEADS):
            sl = slice(h * HEAD_DIM, (h + 1) * HEAD_DIM)
            sc = jnp.einsum(
                "bqd,bkd->bqk", q3[:, :, sl], k3[:, :, sl],
                preferred_element_type=jnp.float32,
            )
            sc = sc + bias
            m = jnp.max(sc, axis=-1, keepdims=True)
            p = jnp.exp(sc - m)
            p = p * pl.reciprocal(jnp.sum(p, axis=-1, keepdims=True), approx=True)
            head_ctx.append(
                jnp.einsum("bqk,bkd->bqd", p, v3[:, :, sl],
                           preferred_element_type=jnp.float32)
            )
        ctx = jnp.concatenate(head_ctx, axis=-1).reshape(b * s, HIDDEN)

        # ---- attn output projection + residual + LayerNorm (post-LN) ----
        attn = jnp.dot(ctx, wo_ref[li], preferred_element_type=jnp.float32) + bo_ref[li]
        x = layernorm(x + attn, aln_g_ref[li], aln_b_ref[li])

        # ---- fused FFN: W1 + GELU + W2 + residual + LayerNorm ----
        hdn = jnp.dot(x, w1_ref[li], preferred_element_type=jnp.float32) + b1_ref[li]
        # TODO(synk): RoBERTa uses exact (erf) GELU; tanh approximation used for robust Mosaic lowering.
        hdn = jax.nn.gelu(hdn, approximate=True)
        hdn = jnp.dot(hdn, w2_ref[li], preferred_element_type=jnp.float32) + b2_ref[li]
        x = layernorm(x + hdn, fln_g_ref[li], fln_b_ref[li])

    # ---- prompt-row selection (one-hot matmul) + vocab projection (lane-dense output) ----
    sel = jnp.dot(onehot_ref[...], x, preferred_element_type=jnp.float32)        # [B, H]
    logits = jnp.dot(sel, wemb_t_ref[...], preferred_element_type=jnp.float32)   # [B, V=128]
    o_ref[...] = logits.astype(o_ref.dtype)


# ------------------------------ parameters ------------------------------
def init_params(key):
    def nrm(k, shape, std=0.02):
        return std * jax.random.normal(k, shape, dtype=jnp.float32)

    keys = jax.random.split(key, 4 + N_LAYERS)
    params = {
        "word_emb": nrm(keys[0], (VOCAB, HIDDEN)),
        "pos_emb": nrm(keys[1], (MAX_POS, HIDDEN)),
        "type_emb": nrm(keys[2], (1, HIDDEN)),
        "emb_ln_g": jnp.ones((HIDDEN,), jnp.float32),
        "emb_ln_b": jnp.zeros((HIDDEN,), jnp.float32),
        "layers": [],
    }
    for li in range(N_LAYERS):
        lk = jax.random.split(keys[4 + li], 6)
        params["layers"].append(
            {
                "wq": nrm(lk[0], (HIDDEN, HIDDEN)),
                "bq": jnp.zeros((HIDDEN,), jnp.float32),
                "wk": nrm(lk[1], (HIDDEN, HIDDEN)),
                "bk": jnp.zeros((HIDDEN,), jnp.float32),
                "wv": nrm(lk[2], (HIDDEN, HIDDEN)),
                "bv": jnp.zeros((HIDDEN,), jnp.float32),
                "wo": nrm(lk[3], (HIDDEN, HIDDEN)),
                "bo": jnp.zeros((HIDDEN,), jnp.float32),
                "attn_ln_g": jnp.ones((HIDDEN,), jnp.float32),
                "attn_ln_b": jnp.zeros((HIDDEN,), jnp.float32),
                "w1": nrm(lk[4], (HIDDEN, INTERMEDIATE)),
                "b1": jnp.zeros((INTERMEDIATE,), jnp.float32),
                "w2": nrm(lk[5], (INTERMEDIATE, HIDDEN)),
                "b2": jnp.zeros((HIDDEN,), jnp.float32),
                "ffn_ln_g": jnp.ones((HIDDEN,), jnp.float32),
                "ffn_ln_b": jnp.zeros((HIDDEN,), jnp.float32),
            }
        )
    return params


def prepare_fused(params):
    """One-time prep: fuse QKV weights (with the attention scale folded into Wq/bq),
    stack per-layer weights along a leading layer axis, and pre-transpose word_emb."""
    scale = 1.0 / (HEAD_DIM ** 0.5)

    def stack(fn):
        return jnp.stack([fn(l) for l in params["layers"]])

    return {
        "word_emb": params["word_emb"],
        "pos_emb": params["pos_emb"],
        "type_emb": params["type_emb"],
        "emb_ln_g": params["emb_ln_g"].reshape(1, HIDDEN),
        "emb_ln_b": params["emb_ln_b"].reshape(1, HIDDEN),
        "wqkv": stack(lambda l: jnp.concatenate(
            [l["wq"] * scale, l["wk"], l["wv"]], axis=1)),                      # [L, H, 3H]
        "bqkv": stack(lambda l: jnp.concatenate(
            [l["bq"] * scale, l["bk"], l["bv"]]).reshape(1, 3 * HIDDEN)),       # [L, 1, 3H]
        "wo": stack(lambda l: l["wo"]),
        "bo": stack(lambda l: l["bo"].reshape(1, HIDDEN)),
        "aln_g": stack(lambda l: l["attn_ln_g"].reshape(1, HIDDEN)),
        "aln_b": stack(lambda l: l["attn_ln_b"].reshape(1, HIDDEN)),
        "w1": stack(lambda l: l["w1"]),
        "b1": stack(lambda l: l["b1"].reshape(1, INTERMEDIATE)),
        "w2": stack(lambda l: l["w2"]),
        "b2": stack(lambda l: l["b2"].reshape(1, HIDDEN)),
        "fln_g": stack(lambda l: l["ffn_ln_g"].reshape(1, HIDDEN)),
        "fln_b": stack(lambda l: l["ffn_ln_b"].reshape(1, HIDDEN)),
        "wemb_t": params["word_emb"].T,                                         # [H, V]
    }


# ------------------------------ forward (glue) ------------------------------
@jax.jit
def _forward_core(fused, input_ids, attention_mask, prompt_label_idx):
    b, s = input_ids.shape

    # embedding gathers (tiny XLA glue; RoBERTa position offset / dropout simplified)
    word = fused["word_emb"][input_ids]                 # [B, S, H]
    pos = fused["pos_emb"][jnp.arange(s)][None, :, :]   # [1, S, H]
    tok = fused["type_emb"][0][None, None, :]           # [1, 1, H]
    x = (word + pos + tok).reshape(b * s, HIDDEN)

    # additive attention bias: 0 for valid keys, -1e9 for padded keys
    bias = ((1.0 - attention_mask.astype(jnp.float32)) * -1e9)[:, None, :]  # [B, 1, S]

    # one-hot selector for the prompt-label rows of the [B*S, H] encoding
    rows = jnp.arange(b, dtype=jnp.int32) * s + prompt_label_idx
    onehot = jax.nn.one_hot(rows, b * s, dtype=jnp.float32)                 # [B, B*S]

    kernel = functools.partial(_fused_forward_kernel, b=b, s=s)
    logits = pl.pallas_call(
        kernel,
        out_shape=jax.ShapeDtypeStruct((b, VOCAB), jnp.float32),
    )(
        x, bias, onehot,
        fused["emb_ln_g"], fused["emb_ln_b"],
        fused["wqkv"], fused["bqkv"],
        fused["wo"], fused["bo"],
        fused["aln_g"], fused["aln_b"],
        fused["w1"], fused["b1"],
        fused["w2"], fused["b2"],
        fused["fln_g"], fused["fln_b"],
        fused["wemb_t"],
    )
    return logits


def model_forward(fused, input_ids, attention_mask, prompt_label_idx, labels=None):
    """Mirrors Model.forward: returns a list (length=batch) of [1, VOCAB] logits."""
    del labels  # accepted but unused by the PyTorch forward's return value
    b = input_ids.shape[0]
    logits_all = _forward_core(fused, input_ids, attention_mask, prompt_label_idx)  # [B, V]
    # keep the reference API (list of per-example [1, V] tensors); split on host only
    return [logits_all[i : i + 1] for i in range(b)]


# --------------------------------- main ---------------------------------
if __name__ == "__main__":
    key = jax.random.PRNGKey(0)
    kp, ki, km, kl = jax.random.split(key, 4)

    params = init_params(kp)
    fused = prepare_fused(params)

    input_ids = jax.random.randint(ki, (BATCH, SEQ), 0, VOCAB, dtype=jnp.int32)
    attention_mask = jnp.ones((BATCH, SEQ), dtype=jnp.int32).at[:, -2:].set(0)
    prompt_label_idx = jax.random.randint(kl, (BATCH,), 0, SEQ - 2, dtype=jnp.int32)
    labels = jax.random.randint(km, (BATCH,), 0, VOCAB, dtype=jnp.int32)

    logits = model_forward(fused, input_ids, attention_mask, prompt_label_idx, labels)
    for l in logits:
        jax.block_until_ready(l)

    assert len(logits) == BATCH
    assert all(l.shape == (1, VOCAB) for l in logits)
    print("KERNEL_OK")
</pallas_src>

<mosaic_0001>
module attributes {stable_mosaic.version = 11 : i64} {
  func.func @_fused_forward_kernel(%arg0: memref<16x32xf32, #tpu.memory_space<vmem>>, %arg1: memref<2x1x8xf32, #tpu.memory_space<vmem>>, %arg2: memref<2x16xf32, #tpu.memory_space<vmem>>, %arg3: memref<1x32xf32, #tpu.memory_space<vmem>>, %arg4: memref<1x32xf32, #tpu.memory_space<vmem>>, %arg5: memref<2x32x96xf32, #tpu.memory_space<vmem>>, %arg6: memref<2x1x96xf32, #tpu.memory_space<vmem>>, %arg7: memref<2x32x32xf32, #tpu.memory_space<vmem>>, %arg8: memref<2x1x32xf32, #tpu.memory_space<vmem>>, %arg9: memref<2x1x32xf32, #tpu.memory_space<vmem>>, %arg10: memref<2x1x32xf32, #tpu.memory_space<vmem>>, %arg11: memref<2x32x64xf32, #tpu.memory_space<vmem>>, %arg12: memref<2x1x64xf32, #tpu.memory_space<vmem>>, %arg13: memref<2x64x32xf32, #tpu.memory_space<vmem>>, %arg14: memref<2x1x32xf32, #tpu.memory_space<vmem>>, %arg15: memref<2x1x32xf32, #tpu.memory_space<vmem>>, %arg16: memref<2x1x32xf32, #tpu.memory_space<vmem>>, %arg17: memref<32x128xf32, #tpu.memory_space<vmem>>, %arg18: memref<2x128xf32, #tpu.memory_space<vmem>>) attributes {dimension_semantics = [], scalar_prefetch = 0 : i64, scratch_operands = 0 : i64, tpu.core_type = #tpu.core_type<tc>} {
    %c0 = arith.constant 0 : index
    %c0_0 = arith.constant 0 : index
    %0 = vector.load %arg0[%c0, %c0_0] : memref<16x32xf32, #tpu.memory_space<vmem>>, vector<16x32xf32>
    %c0_1 = arith.constant 0 : index
    %c0_2 = arith.constant 0 : index
    %1 = vector.load %arg3[%c0_1, %c0_2] : memref<1x32xf32, #tpu.memory_space<vmem>>, vector<1x32xf32>
    %c0_3 = arith.constant 0 : index
    %c0_4 = arith.constant 0 : index
    %2 = vector.load %arg4[%c0_3, %c0_4] : memref<1x32xf32, #tpu.memory_space<vmem>>, vector<1x32xf32>
    %cst = arith.constant dense<0.000000e+00> : vector<16xf32>
    %3 = vector.multi_reduction <add>, %0, %cst [1] : vector<16x32xf32> to vector<16xf32>
    %4 = vector.shape_cast %3 : vector<16xf32> to vector<16x1xf32>
    %cst_5 = arith.constant 3.200000e+01 : f32
    %5 = vector.broadcast %cst_5 : f32 to vector<16x1xf32>
    %6 = arith.divf %4, %5 : vector<16x1xf32>
    %7 = vector.broadcast %6 : vector<16x1xf32> to vector<16x32xf32>
    %8 = arith.subf %0, %7 : vector<16x32xf32>
    %9 = arith.mulf %8, %8 : vector<16x32xf32>
    %cst_6 = arith.constant dense<0.000000e+00> : vector<16xf32>
    %10 = vector.multi_reduction <add>, %9, %cst_6 [1] : vector<16x32xf32> to vector<16xf32>
    %11 = vector.shape_cast %10 : vector<16xf32> to vector<16x1xf32>
    %cst_7 = arith.constant 3.200000e+01 : f32
    %12 = vector.broadcast %cst_7 : f32 to vector<16x1xf32>
    %13 = arith.divf %11, %12 : vector<16x1xf32>
    %cst_8 = arith.constant 9.99999974E-6 : f32
    %14 = vector.broadcast %cst_8 : f32 to vector<16x1xf32>
    %15 = arith.addf %13, %14 : vector<16x1xf32>
    %16 = math.rsqrt %15 : vector<16x1xf32>
    %17 = vector.broadcast %16 : vector<16x1xf32> to vector<16x32xf32>
    %18 = arith.mulf %8, %17 : vector<16x32xf32>
    %19 = vector.broadcast %1 : vector<1x32xf32> to vector<16x32xf32>
    %20 = arith.mulf %18, %19 : vector<16x32xf32>
    %21 = vector.broadcast %2 : vector<1x32xf32> to vector<16x32xf32>
    %22 = arith.addf %20, %21 : vector<16x32xf32>
    %c0_9 = arith.constant 0 : index
    %c0_10 = arith.constant 0 : index
    %c0_11 = arith.constant 0 : index
    %23 = vector.load %arg1[%c0_9, %c0_10, %c0_11] : memref<2x1x8xf32, #tpu.memory_space<vmem>>, vector<2x1x8xf32>
    %c0_12 = arith.constant 0 : index
    %c0_13 = arith.constant 0 : index
    %c0_14 = arith.constant 0 : index
    %24 = vector.load %arg5[%c0_12, %c0_13, %c0_14] : memref<2x32x96xf32, #tpu.memory_space<vmem>>, vector<1x32x96xf32>
    %25 = vector.shape_cast %24 : vector<1x32x96xf32> to vector<32x96xf32>
    %cst_15 = arith.constant dense<0.000000e+00> : vector<16x96xf32>
    %26 = tpu.matmul %22, %25, %cst_15 {dimension_numbers = #tpu.dot_dimension_numbers<[1], [0], [0], [1], [0, 0, 1, 1], [], []>} : vector<16x32xf32>, vector<32x96xf32>, vector<16x96xf32> -> vector<16x96xf32>
    %c0_16 = arith.constant 0 : index
    %c0_17 = arith.constant 0 : index
    %c0_18 = arith.constant 0 : index
    %27 = vector.load %arg6[%c0_16, %c0_17, %c0_18] : memref<2x1x96xf32, #tpu.memory_space<vmem>>, vector<1x1x96xf32>
    %28 = vector.shape_cast %27 : vector<1x1x96xf32> to vector<1x96xf32>
    %29 = vector.broadcast %28 : vector<1x96xf32> to vector<16x96xf32>
    %30 = arith.addf %26, %29 : vector<16x96xf32>
    %31 = vector.extract_strided_slice %30 {offsets = [0, 0], sizes = [16, 32], strides = [1, 1]} : vector<16x96xf32> to vector<16x32xf32>
    %32 = vector.shape_cast %31 : vector<16x32xf32> to vector<2x8x32xf32>
    %33 = vector.extract_strided_slice %30 {offsets = [0, 32], sizes = [16, 32], strides = [1, 1]} : vector<16x96xf32> to vector<16x32xf32>
    %34 = vector.shape_cast %33 : vector<16x32xf32> to vector<2x8x32xf32>
    %35 = vector.extract_strided_slice %30 {offsets = [0, 64], sizes = [16, 32], strides = [1, 1]} : vector<16x96xf32> to vector<16x32xf32>
    %36 = vector.shape_cast %35 : vector<16x32xf32> to vector<2x8x32xf32>
    %37 = vector.extract_strided_slice %32 {offsets = [0, 0, 0], sizes = [2, 8, 16], strides = [1, 1, 1]} : vector<2x8x32xf32> to vector<2x8x16xf32>
    %38 = vector.extract_strided_slice %34 {offsets = [0, 0, 0], sizes = [2, 8, 16], strides = [1, 1, 1]} : vector<2x8x32xf32> to vector<2x8x16xf32>
    "tpu.trace_start"() <{level = 10 : i32, message = "bqd,bkd->bqk"}> : () -> ()
    %cst_19 = arith.constant dense<0.000000e+00> : vector<2x8x8xf32>
    %39 = tpu.matmul %37, %38, %cst_19 {dimension_numbers = #tpu.dot_dimension_numbers<[2], [2], [1], [1], [0, 0, 0, 1, 1, 1], [0], [0]>} : vector<2x8x16xf32>, vector<2x8x16xf32>, vector<2x8x8xf32> -> vector<2x8x8xf32>
    "tpu.trace_stop"() : () -> ()
    %40 = vector.broadcast %23 : vector<2x1x8xf32> to vector<2x8x8xf32>
    %41 = arith.addf %39, %40 : vector<2x8x8xf32>
    %cst_20 = arith.constant dense<0xFF800000> : vector<2x8xf32>
    %42 = vector.multi_reduction <maximumf>, %41, %cst_20 [2] : vector<2x8x8xf32> to vector<2x8xf32>
    %43 = vector.shape_cast %42 : vector<2x8xf32> to vector<2x8x1xf32>
    %44 = vector.broadcast %43 : vector<2x8x1xf32> to vector<2x8x8xf32>
    %45 = arith.subf %41, %44 : vector<2x8x8xf32>
    %46 = math.exp %45 : vector<2x8x8xf32>
    %cst_21 = arith.constant dense<0.000000e+00> : vector<2x8xf32>
    %47 = vector.multi_reduction <add>, %46, %cst_21 [2] : vector<2x8x8xf32> to vector<2x8xf32>
    %48 = vector.shape_cast %47 : vector<2x8xf32> to vector<2x8x1xf32>
    %49 = tpu.reciprocal %48 {approx = true} : vector<2x8x1xf32> -> vector<2x8x1xf32>
    %50 = vector.broadcast %49 : vector<2x8x1xf32> to vector<2x8x8xf32>
    %51 = arith.mulf %46, %50 : vector<2x8x8xf32>
    %52 = vector.extract_strided_slice %36 {offsets = [0, 0, 0], sizes = [2, 8, 16], strides = [1, 1, 1]} : vector<2x8x32xf32> to vector<2x8x16xf32>
    "tpu.trace_start"() <{level = 10 : i32, message = "bqk,bkd->bqd"}> : () -> ()
    %cst_22 = arith.constant dense<0.000000e+00> : vector<2x8x16xf32>
    %53 = tpu.matmul %51, %52, %cst_22 {dimension_numbers = #tpu.dot_dimension_numbers<[2], [1], [1], [2], [0, 0, 0, 1, 1, 2], [0], [0]>} : vector<2x8x8xf32>, vector<2x8x16xf32>, vector<2x8x16xf32> -> vector<2x8x16xf32>
    "tpu.trace_stop"() : () -> ()
    %54 = vector.extract_strided_slice %32 {offsets = [0, 0, 16], sizes = [2, 8, 16], strides = [1, 1, 1]} : vector<2x8x32xf32> to vector<2x8x16xf32>
    %55 = vector.extract_strided_slice %34 {offsets = [0, 0, 16], sizes = [2, 8, 16], strides = [1, 1, 1]} : vector<2x8x32xf32> to vector<2x8x16xf32>
    "tpu.trace_start"() <{level = 10 : i32, message = "bqd,bkd->bqk"}> : () -> ()
    %cst_23 = arith.constant dense<0.000000e+00> : vector<2x8x8xf32>
    %56 = tpu.matmul %54, %55, %cst_23 {dimension_numbers = #tpu.dot_dimension_numbers<[2], [2], [1], [1], [0, 0, 0, 1, 1, 1], [0], [0]>} : vector<2x8x16xf32>, vector<2x8x16xf32>, vector<2x8x8xf32> -> vector<2x8x8xf32>
    "tpu.trace_stop"() : () -> ()
    %57 = vector.broadcast %23 : vector<2x1x8xf32> to vector<2x8x8xf32>
    %58 = arith.addf %56, %57 : vector<2x8x8xf32>
    %cst_24 = arith.constant dense<0xFF800000> : vector<2x8xf32>
    %59 = vector.multi_reduction <maximumf>, %58, %cst_24 [2] : vector<2x8x8xf32> to vector<2x8xf32>
    %60 = vector.shape_cast %59 : vector<2x8xf32> to vector<2x8x1xf32>
    %61 = vector.broadcast %60 : vector<2x8x1xf32> to vector<2x8x8xf32>
    %62 = arith.subf %58, %61 : vector<2x8x8xf32>
    %63 = math.exp %62 : vector<2x8x8xf32>
    %cst_25 = arith.constant dense<0.000000e+00> : vector<2x8xf32>
    %64 = vector.multi_reduction <add>, %63, %cst_25 [2] : vector<2x8x8xf32> to vector<2x8xf32>
    %65 = vector.shape_cast %64 : vector<2x8xf32> to vector<2x8x1xf32>
    %66 = tpu.reciprocal %65 {approx = true} : vector<2x8x1xf32> -> vector<2x8x1xf32>
    %67 = vector.broadcast %66 : vector<2x8x1xf32> to vector<2x8x8xf32>
    %68 = arith.mulf %63, %67 : vector<2x8x8xf32>
    %69 = vector.extract_strided_slice %36 {offsets = [0, 0, 16], sizes = [2, 8, 16], strides = [1, 1, 1]} : vector<2x8x32xf32> to vector<2x8x16xf32>
    "tpu.trace_start"() <{level = 10 : i32, message = "bqk,bkd->bqd"}> : () -> ()
    %cst_26 = arith.constant dense<0.000000e+00> : vector<2x8x16xf32>
    %70 = tpu.matmul %68, %69, %cst_26 {dimension_numbers = #tpu.dot_dimension_numbers<[2], [1], [1], [2], [0, 0, 0, 1, 1, 2], [0], [0]>} : vector<2x8x8xf32>, vector<2x8x16xf32>, vector<2x8x16xf32> -> vector<2x8x16xf32>
    "tpu.trace_stop"() : () -> ()
    %71 = tpu.concatenate %53, %70 in 2 : vector<2x8x16xf32>, vector<2x8x16xf32> -> vector<2x8x32xf32>
    %72 = vector.shape_cast %71 : vector<2x8x32xf32> to vector<16x32xf32>
    %c0_27 = arith.constant 0 : index
    %c0_28 = arith.constant 0 : index
    %c0_29 = arith.constant 0 : index
    %73 = vector.load %arg7[%c0_27, %c0_28, %c0_29] : memref<2x32x32xf32, #tpu.memory_space<vmem>>, vector<1x32x32xf32>
    %74 = vector.shape_cast %73 : vector<1x32x32xf32> to vector<32x32xf32>
    %cst_30 = arith.constant dense<0.000000e+00> : vector<16x32xf32>
    %75 = tpu.matmul %72, %74, %cst_30 {dimension_numbers = #tpu.dot_dimension_numbers<[1], [0], [0], [1], [0, 0, 1, 1], [], []>} : vector<16x32xf32>, vector<32x32xf32>, vector<16x32xf32> -> vector<16x32xf32>
    %c0_31 = arith.constant 0 : index
    %c0_32 = arith.constant 0 : index
    %c0_33 = arith.constant 0 : index
    %76 = vector.load %arg8[%c0_31, %c0_32, %c0_33] : memref<2x1x32xf32, #tpu.memory_space<vmem>>, vector<1x1x32xf32>
    %77 = vector.shape_cast %76 : vector<1x1x32xf32> to vector<1x32xf32>
    %78 = vector.broadcast %77 : vector<1x32xf32> to vector<16x32xf32>
    %79 = arith.addf %75, %78 : vector<16x32xf32>
    %80 = arith.addf %22, %79 : vector<16x32xf32>
    %c0_34 = arith.constant 0 : index
    %c0_35 = arith.constant 0 : index
    %c0_36 = arith.constant 0 : index
    %81 = vector.load %arg9[%c0_34, %c0_35, %c0_36] : memref<2x1x32xf32, #tpu.memory_space<vmem>>, vector<1x1x32xf32>
    %82 = vector.shape_cast %81 : vector<1x1x32xf32> to vector<1x32xf32>
    %c0_37 = arith.constant 0 : index
    %c0_38 = arith.constant 0 : index
    %c0_39 = arith.constant 0 : index
    %83 = vector.load %arg10[%c0_37, %c0_38, %c0_39] : memref<2x1x32xf32, #tpu.memory_space<vmem>>, vector<1x1x32xf32>
    %84 = vector.shape_cast %83 : vector<1x1x32xf32> to vector<1x32xf32>
    %cst_40 = arith.constant dense<0.000000e+00> : vector<16xf32>
    %85 = vector.multi_reduction <add>, %80, %cst_40 [1] : vector<16x32xf32> to vector<16xf32>
    %86 = vector.shape_cast %85 : vector<16xf32> to vector<16x1xf32>
    %cst_41 = arith.constant 3.200000e+01 : f32
    %87 = vector.broadcast %cst_41 : f32 to vector<16x1xf32>
    %88 = arith.divf %86, %87 : vector<16x1xf32>
    %89 = vector.broadcast %88 : vector<16x1xf32> to vector<16x32xf32>
    %90 = arith.subf %80, %89 : vector<16x32xf32>
    %91 = arith.mulf %90, %90 : vector<16x32xf32>
    %cst_42 = arith.constant dense<0.000000e+00> : vector<16xf32>
    %92 = vector.multi_reduction <add>, %91, %cst_42 [1] : vector<16x32xf32> to vector<16xf32>
    %93 = vector.shape_cast %92 : vector<16xf32> to vector<16x1xf32>
    %cst_43 = arith.constant 3.200000e+01 : f32
    %94 = vector.broadcast %cst_43 : f32 to vector<16x1xf32>
    %95 = arith.divf %93, %94 : vector<16x1xf32>
    %cst_44 = arith.constant 9.99999974E-6 : f32
    %96 = vector.broadcast %cst_44 : f32 to vector<16x1xf32>
    %97 = arith.addf %95, %96 : vector<16x1xf32>
    %98 = math.rsqrt %97 : vector<16x1xf32>
    %99 = vector.broadcast %98 : vector<16x1xf32> to vector<16x32xf32>
    %100 = arith.mulf %90, %99 : vector<16x32xf32>
    %101 = vector.broadcast %82 : vector<1x32xf32> to vector<16x32xf32>
    %102 = arith.mulf %100, %101 : vector<16x32xf32>
    %103 = vector.broadcast %84 : vector<1x32xf32> to vector<16x32xf32>
    %104 = arith.addf %102, %103 : vector<16x32xf32>
    %c0_45 = arith.constant 0 : index
    %c0_46 = arith.constant 0 : index
    %c0_47 = arith.constant 0 : index
    %105 = vector.load %arg11[%c0_45, %c0_46, %c0_47] : memref<2x32x64xf32, #tpu.memory_space<vmem>>, vector<1x32x64xf32>
    %106 = vector.shape_cast %105 : vector<1x32x64xf32> to vector<32x64xf32>
    %cst_48 = arith.constant dense<0.000000e+00> : vector<16x64xf32>
    %107 = tpu.matmul %104, %106, %cst_48 {dimension_numbers = #tpu.dot_dimension_numbers<[1], [0], [0], [1], [0, 0, 1, 1], [], []>} : vector<16x32xf32>, vector<32x64xf32>, vector<16x64xf32> -> vector<16x64xf32>
    %c0_49 = arith.constant 0 : index
    %c0_50 = arith.constant 0 : index
    %c0_51 = arith.constant 0 : index
    %108 = vector.load %arg12[%c0_49, %c0_50, %c0_51] : memref<2x1x64xf32, #tpu.memory_space<vmem>>, vector<1x1x64xf32>
    %109 = vector.shape_cast %108 : vector<1x1x64xf32> to vector<1x64xf32>
    %110 = vector.broadcast %109 : vector<1x64xf32> to vector<16x64xf32>
    %111 = arith.addf %107, %110 : vector<16x64xf32>
    %112 = arith.mulf %111, %111 : vector<16x64xf32>
    %113 = arith.mulf %111, %112 : vector<16x64xf32>
    %cst_52 = arith.constant 4.471500e-02 : f32
    %114 = vector.broadcast %cst_52 : f32 to vector<16x64xf32>
    %115 = arith.mulf %114, %113 : vector<16x64xf32>
    %116 = arith.addf %111, %115 : vector<16x64xf32>
    %cst_53 = arith.constant 0.797884583 : f32
    %117 = vector.broadcast %cst_53 : f32 to vector<16x64xf32>
    %118 = arith.mulf %117, %116 : vector<16x64xf32>
    %119 = math.tanh %118 : vector<16x64xf32>
    %cst_54 = arith.constant 1.000000e+00 : f32
    %120 = vector.broadcast %cst_54 : f32 to vector<16x64xf32>
    %121 = arith.addf %120, %119 : vector<16x64xf32>
    %cst_55 = arith.constant 5.000000e-01 : f32
    %122 = vector.broadcast %cst_55 : f32 to vector<16x64xf32>
    %123 = arith.mulf %122, %121 : vector<16x64xf32>
    %124 = arith.mulf %111, %123 : vector<16x64xf32>
    %c0_56 = arith.constant 0 : index
    %c0_57 = arith.constant 0 : index
    %c0_58 = arith.constant 0 : index
    %125 = vector.load %arg13[%c0_56, %c0_57, %c0_58] : memref<2x64x32xf32, #tpu.memory_space<vmem>>, vector<1x64x32xf32>
    %126 = vector.shape_cast %125 : vector<1x64x32xf32> to vector<64x32xf32>
    %cst_59 = arith.constant dense<0.000000e+00> : vector<16x32xf32>
    %127 = tpu.matmul %124, %126, %cst_59 {dimension_numbers = #tpu.dot_dimension_numbers<[1], [0], [0], [1], [0, 0, 1, 1], [], []>} : vector<16x64xf32>, vector<64x32xf32>, vector<16x32xf32> -> vector<16x32xf32>
    %c0_60 = arith.constant 0 : index
    %c0_61 = arith.constant 0 : index
    %c0_62 = arith.constant 0 : index
    %128 = vector.load %arg14[%c0_60, %c0_61, %c0_62] : memref<2x1x32xf32, #tpu.memory_space<vmem>>, vector<1x1x32xf32>
    %129 = vector.shape_cast %128 : vector<1x1x32xf32> to vector<1x32xf32>
    %130 = vector.broadcast %129 : vector<1x32xf32> to vector<16x32xf32>
    %131 = arith.addf %127, %130 : vector<16x32xf32>
    %132 = arith.addf %104, %131 : vector<16x32xf32>
    %c0_63 = arith.constant 0 : index
    %c0_64 = arith.constant 0 : index
    %c0_65 = arith.constant 0 : index
    %133 = vector.load %arg15[%c0_63, %c0_64, %c0_65] : memref<2x1x32xf32, #tpu.memory_space<vmem>>, vector<1x1x32xf32>
    %134 = vector.shape_cast %133 : vector<1x1x32xf32> to vector<1x32xf32>
    %c0_66 = arith.constant 0 : index
    %c0_67 = arith.constant 0 : index
    %c0_68 = arith.constant 0 : index
    %135 = vector.load %arg16[%c0_66, %c0_67, %c0_68] : memref<2x1x32xf32, #tpu.memory_space<vmem>>, vector<1x1x32xf32>
    %136 = vector.shape_cast %135 : vector<1x1x32xf32> to vector<1x32xf32>
    %cst_69 = arith.constant dense<0.000000e+00> : vector<16xf32>
    %137 = vector.multi_reduction <add>, %132, %cst_69 [1] : vector<16x32xf32> to vector<16xf32>
    %138 = vector.shape_cast %137 : vector<16xf32> to vector<16x1xf32>
    %cst_70 = arith.constant 3.200000e+01 : f32
    %139 = vector.broadcast %cst_70 : f32 to vector<16x1xf32>
    %140 = arith.divf %138, %139 : vector<16x1xf32>
    %141 = vector.broadcast %140 : vector<16x1xf32> to vector<16x32xf32>
    %142 = arith.subf %132, %141 : vector<16x32xf32>
    %143 = arith.mulf %142, %142 : vector<16x32xf32>
    %cst_71 = arith.constant dense<0.000000e+00> : vector<16xf32>
    %144 = vector.multi_reduction <add>, %143, %cst_71 [1] : vector<16x32xf32> to vector<16xf32>
    %145 = vector.shape_cast %144 : vector<16xf32> to vector<16x1xf32>
    %cst_72 = arith.constant 3.200000e+01 : f32
    %146 = vector.broadcast %cst_72 : f32 to vector<16x1xf32>
    %147 = arith.divf %145, %146 : vector<16x1xf32>
    %cst_73 = arith.constant 9.99999974E-6 : f32
    %148 = vector.broadcast %cst_73 : f32 to vector<16x1xf32>
    %149 = arith.addf %147, %148 : vector<16x1xf32>
    %150 = math.rsqrt %149 : vector<16x1xf32>
    %151 = vector.broadcast %150 : vector<16x1xf32> to vector<16x32xf32>
    %152 = arith.mulf %142, %151 : vector<16x32xf32>
    %153 = vector.broadcast %134 : vector<1x32xf32> to vector<16x32xf32>
    %154 = arith.mulf %152, %153 : vector<16x32xf32>
    %155 = vector.broadcast %136 : vector<1x32xf32> to vector<16x32xf32>
    %156 = arith.addf %154, %155 : vector<16x32xf32>
    %c1 = arith.constant 1 : index
    %c0_74 = arith.constant 0 : index
    %c0_75 = arith.constant 0 : index
    %157 = vector.load %arg5[%c1, %c0_74, %c0_75] : memref<2x32x96xf32, #tpu.memory_space<vmem>>, vector<1x32x96xf32>
    %158 = vector.shape_cast %157 : vector<1x32x96xf32> to vector<32x96xf32>
    %cst_76 = arith.constant dense<0.000000e+00> : vector<16x96xf32>
    %159 = tpu.matmul %156, %158, %cst_76 {dimension_numbers = #tpu.dot_dimension_numbers<[1], [0], [0], [1], [0, 0, 1, 1], [], []>} : vector<16x32xf32>, vector<32x96xf32>, vector<16x96xf32> -> vector<16x96xf32>
    %c1_77 = arith.constant 1 : index
    %c0_78 = arith.constant 0 : index
    %c0_79 = arith.constant 0 : index
    %160 = vector.load %arg6[%c1_77, %c0_78, %c0_79] : memref<2x1x96xf32, #tpu.memory_space<vmem>>, vector<1x1x96xf32>
    %161 = vector.shape_cast %160 : vector<1x1x96xf32> to vector<1x96xf32>
    %162 = vector.broadcast %161 : vector<1x96xf32> to vector<16x96xf32>
    %163 = arith.addf %159, %162 : vector<16x96xf32>
    %164 = vector.extract_strided_slice %163 {offsets = [0, 0], sizes = [16, 32], strides = [1, 1]} : vector<16x96xf32> to vector<16x32xf32>
    %165 = vector.shape_cast %164 : vector<16x32xf32> to vector<2x8x32xf32>
    %166 = vector.extract_strided_slice %163 {offsets = [0, 32], sizes = [16, 32], strides = [1, 1]} : vector<16x96xf32> to vector<16x32xf32>
    %167 = vector.shape_cast %166 : vector<16x32xf32> to vector<2x8x32xf32>
    %168 = vector.extract_strided_slice %163 {offsets = [0, 64], sizes = [16, 32], strides = [1, 1]} : vector<16x96xf32> to vector<16x32xf32>
    %169 = vector.shape_cast %168 : vector<16x32xf32> to vector<2x8x32xf32>
    %170 = vector.extract_strided_slice %165 {offsets = [0, 0, 0], sizes = [2, 8, 16], strides = [1, 1, 1]} : vector<2x8x32xf32> to vector<2x8x16xf32>
    %171 = vector.extract_strided_slice %167 {offsets = [0, 0, 0], sizes = [2, 8, 16], strides = [1, 1, 1]} : vector<2x8x32xf32> to vector<2x8x16xf32>
    "tpu.trace_start"() <{level = 10 : i32, message = "bqd,bkd->bqk"}> : () -> ()
    %cst_80 = arith.constant dense<0.000000e+00> : vector<2x8x8xf32>
    %172 = tpu.matmul %170, %171, %cst_80 {dimension_numbers = #tpu.dot_dimension_numbers<[2], [2], [1], [1], [0, 0, 0, 1, 1, 1], [0], [0]>} : vector<2x8x16xf32>, vector<2x8x16xf32>, vector<2x8x8xf32> -> vector<2x8x8xf32>
    "tpu.trace_stop"() : () -> ()
    %173 = vector.broadcast %23 : vector<2x1x8xf32> to vector<2x8x8xf32>
    %174 = arith.addf %172, %173 : vector<2x8x8xf32>
    %cst_81 = arith.constant dense<0xFF800000> : vector<2x8xf32>
    %175 = vector.multi_reduction <maximumf>, %174, %cst_81 [2] : vector<2x8x8xf32> to vector<2x8xf32>
    %176 = vector.shape_cast %175 : vector<2x8xf32> to vector<2x8x1xf32>
    %177 = vector.broadcast %176 : vector<2x8x1xf32> to vector<2x8x8xf32>
    %178 = arith.subf %174, %177 : vector<2x8x8xf32>
    %179 = math.exp %178 : vector<2x8x8xf32>
    %cst_82 = arith.constant dense<0.000000e+00> : vector<2x8xf32>
    %180 = vector.multi_reduction <add>, %179, %cst_82 [2] : vector<2x8x8xf32> to vector<2x8xf32>
    %181 = vector.shape_cast %180 : vector<2x8xf32> to vector<2x8x1xf32>
    %182 = tpu.reciprocal %181 {approx = true} : vector<2x8x1xf32> -> vector<2x8x1xf32>
    %183 = vector.broadcast %182 : vector<2x8x1xf32> to vector<2x8x8xf32>
    %184 = arith.mulf %179, %183 : vector<2x8x8xf32>
    %185 = vector.extract_strided_slice %169 {offsets = [0, 0, 0], sizes = [2, 8, 16], strides = [1, 1, 1]} : vector<2x8x32xf32> to vector<2x8x16xf32>
    "tpu.trace_start"() <{level = 10 : i32, message = "bqk,bkd->bqd"}> : () -> ()
    %cst_83 = arith.constant dense<0.000000e+00> : vector<2x8x16xf32>
    %186 = tpu.matmul %184, %185, %cst_83 {dimension_numbers = #tpu.dot_dimension_numbers<[2], [1], [1], [2], [0, 0, 0, 1, 1, 2], [0], [0]>} : vector<2x8x8xf32>, vector<2x8x16xf32>, vector<2x8x16xf32> -> vector<2x8x16xf32>
    "tpu.trace_stop"() : () -> ()
    %187 = vector.extract_strided_slice %165 {offsets = [0, 0, 16], sizes = [2, 8, 16], strides = [1, 1, 1]} : vector<2x8x32xf32> to vector<2x8x16xf32>
    %188 = vector.extract_strided_slice %167 {offsets = [0, 0, 16], sizes = [2, 8, 16], strides = [1, 1, 1]} : vector<2x8x32xf32> to vector<2x8x16xf32>
    "tpu.trace_start"() <{level = 10 : i32, message = "bqd,bkd->bqk"}> : () -> ()
    %cst_84 = arith.constant dense<0.000000e+00> : vector<2x8x8xf32>
    %189 = tpu.matmul %187, %188, %cst_84 {dimension_numbers = #tpu.dot_dimension_numbers<[2], [2], [1], [1], [0, 0, 0, 1, 1, 1], [0], [0]>} : vector<2x8x16xf32>, vector<2x8x16xf32>, vector<2x8x8xf32> -> vector<2x8x8xf32>
    "tpu.trace_stop"() : () -> ()
    %190 = vector.broadcast %23 : vector<2x1x8xf32> to vector<2x8x8xf32>
    %191 = arith.addf %189, %190 : vector<2x8x8xf32>
    %cst_85 = arith.constant dense<0xFF800000> : vector<2x8xf32>
    %192 = vector.multi_reduction <maximumf>, %191, %cst_85 [2] : vector<2x8x8xf32> to vector<2x8xf32>
    %193 = vector.shape_cast %192 : vector<2x8xf32> to vector<2x8x1xf32>
    %194 = vector.broadcast %193 : vector<2x8x1xf32> to vector<2x8x8xf32>
    %195 = arith.subf %191, %194 : vector<2x8x8xf32>
    %196 = math.exp %195 : vector<2x8x8xf32>
    %cst_86 = arith.constant dense<0.000000e+00> : vector<2x8xf32>
    %197 = vector.multi_reduction <add>, %196, %cst_86 [2] : vector<2x8x8xf32> to vector<2x8xf32>
    %198 = vector.shape_cast %197 : vector<2x8xf32> to vector<2x8x1xf32>
    %199 = tpu.reciprocal %198 {approx = true} : vector<2x8x1xf32> -> vector<2x8x1xf32>
    %200 = vector.broadcast %199 : vector<2x8x1xf32> to vector<2x8x8xf32>
    %201 = arith.mulf %196, %200 : vector<2x8x8xf32>
    %202 = vector.extract_strided_slice %169 {offsets = [0, 0, 16], sizes = [2, 8, 16], strides = [1, 1, 1]} : vector<2x8x32xf32> to vector<2x8x16xf32>
    "tpu.trace_start"() <{level = 10 : i32, message = "bqk,bkd->bqd"}> : () -> ()
    %cst_87 = arith.constant dense<0.000000e+00> : vector<2x8x16xf32>
    %203 = tpu.matmul %201, %202, %cst_87 {dimension_numbers = #tpu.dot_dimension_numbers<[2], [1], [1], [2], [0, 0, 0, 1, 1, 2], [0], [0]>} : vector<2x8x8xf32>, vector<2x8x16xf32>, vector<2x8x16xf32> -> vector<2x8x16xf32>
    "tpu.trace_stop"() : () -> ()
    %204 = tpu.concatenate %186, %203 in 2 : vector<2x8x16xf32>, vector<2x8x16xf32> -> vector<2x8x32xf32>
    %205 = vector.shape_cast %204 : vector<2x8x32xf32> to vector<16x32xf32>
    %c1_88 = arith.constant 1 : index
    %c0_89 = arith.constant 0 : index
    %c0_90 = arith.constant 0 : index
    %206 = vector.load %arg7[%c1_88, %c0_89, %c0_90] : memref<2x32x32xf32, #tpu.memory_space<vmem>>, vector<1x32x32xf32>
    %207 = vector.shape_cast %206 : vector<1x32x32xf32> to vector<32x32xf32>
    %cst_91 = arith.constant dense<0.000000e+00> : vector<16x32xf32>
    %208 = tpu.matmul %205, %207, %cst_91 {dimension_numbers = #tpu.dot_dimension_numbers<[1], [0], [0], [1], [0, 0, 1, 1], [], []>} : vector<16x32xf32>, vector<32x32xf32>, vector<16x32xf32> -> vector<16x32xf32>
    %c1_92 = arith.constant 1 : index
    %c0_93 = arith.constant 0 : index
    %c0_94 = arith.constant 0 : index
    %209 = vector.load %arg8[%c1_92, %c0_93, %c0_94] : memref<2x1x32xf32, #tpu.memory_space<vmem>>, vector<1x1x32xf32>
    %210 = vector.shape_cast %209 : vector<1x1x32xf32> to vector<1x32xf32>
    %211 = vector.broadcast %210 : vector<1x32xf32> to vector<16x32xf32>
    %212 = arith.addf %208, %211 : vector<16x32xf32>
    %213 = arith.addf %156, %212 : vector<16x32xf32>
    %c1_95 = arith.constant 1 : index
    %c0_96 = arith.constant 0 : index
    %c0_97 = arith.constant 0 : index
    %214 = vector.load %arg9[%c1_95, %c0_96, %c0_97] : memref<2x1x32xf32, #tpu.memory_space<vmem>>, vector<1x1x32xf32>
    %215 = vector.shape_cast %214 : vector<1x1x32xf32> to vector<1x32xf32>
    %c1_98 = arith.constant 1 : index
    %c0_99 = arith.constant 0 : index
    %c0_100 = arith.constant 0 : index
    %216 = vector.load %arg10[%c1_98, %c0_99, %c0_100] : memref<2x1x32xf32, #tpu.memory_space<vmem>>, vector<1x1x32xf32>
    %217 = vector.shape_cast %216 : vector<1x1x32xf32> to vector<1x32xf32>
    %cst_101 = arith.constant dense<0.000000e+00> : vector<16xf32>
    %218 = vector.multi_reduction <add>, %213, %cst_101 [1] : vector<16x32xf32> to vector<16xf32>
    %219 = vector.shape_cast %218 : vector<16xf32> to vector<16x1xf32>
    %cst_102 = arith.constant 3.200000e+01 : f32
    %220 = vector.broadcast %cst_102 : f32 to vector<16x1xf32>
    %221 = arith.divf %219, %220 : vector<16x1xf32>
    %222 = vector.broadcast %221 : vector<16x1xf32> to vector<16x32xf32>
    %223 = arith.subf %213, %222 : vector<16x32xf32>
    %224 = arith.mulf %223, %223 : vector<16x32xf32>
    %cst_103 = arith.constant dense<0.000000e+00> : vector<16xf32>
    %225 = vector.multi_reduction <add>, %224, %cst_103 [1] : vector<16x32xf32> to vector<16xf32>
    %226 = vector.shape_cast %225 : vector<16xf32> to vector<16x1xf32>
    %cst_104 = arith.constant 3.200000e+01 : f32
    %227 = vector.broadcast %cst_104 : f32 to vector<16x1xf32>
    %228 = arith.divf %226, %227 : vector<16x1xf32>
    %cst_105 = arith.constant 9.99999974E-6 : f32
    %229 = vector.broadcast %cst_105 : f32 to vector<16x1xf32>
    %230 = arith.addf %228, %229 : vector<16x1xf32>
    %231 = math.rsqrt %230 : vector<16x1xf32>
    %232 = vector.broadcast %231 : vector<16x1xf32> to vector<16x32xf32>
    %233 = arith.mulf %223, %232 : vector<16x32xf32>
    %234 = vector.broadcast %215 : vector<1x32xf32> to vector<16x32xf32>
    %235 = arith.mulf %233, %234 : vector<16x32xf32>
    %236 = vector.broadcast %217 : vector<1x32xf32> to vector<16x32xf32>
    %237 = arith.addf %235, %236 : vector<16x32xf32>
    %c1_106 = arith.constant 1 : index
    %c0_107 = arith.constant 0 : index
    %c0_108 = arith.constant 0 : index
    %238 = vector.load %arg11[%c1_106, %c0_107, %c0_108] : memref<2x32x64xf32, #tpu.memory_space<vmem>>, vector<1x32x64xf32>
    %239 = vector.shape_cast %238 : vector<1x32x64xf32> to vector<32x64xf32>
    %cst_109 = arith.constant dense<0.000000e+00> : vector<16x64xf32>
    %240 = tpu.matmul %237, %239, %cst_109 {dimension_numbers = #tpu.dot_dimension_numbers<[1], [0], [0], [1], [0, 0, 1, 1], [], []>} : vector<16x32xf32>, vector<32x64xf32>, vector<16x64xf32> -> vector<16x64xf32>
    %c1_110 = arith.constant 1 : index
    %c0_111 = arith.constant 0 : index
    %c0_112 = arith.constant 0 : index
    %241 = vector.load %arg12[%c1_110, %c0_111, %c0_112] : memref<2x1x64xf32, #tpu.memory_space<vmem>>, vector<1x1x64xf32>
    %242 = vector.shape_cast %241 : vector<1x1x64xf32> to vector<1x64xf32>
    %243 = vector.broadcast %242 : vector<1x64xf32> to vector<16x64xf32>
    %244 = arith.addf %240, %243 : vector<16x64xf32>
    %245 = arith.mulf %244, %244 : vector<16x64xf32>
    %246 = arith.mulf %244, %245 : vector<16x64xf32>
    %cst_113 = arith.constant 4.471500e-02 : f32
    %247 = vector.broadcast %cst_113 : f32 to vector<16x64xf32>
    %248 = arith.mulf %247, %246 : vector<16x64xf32>
    %249 = arith.addf %244, %248 : vector<16x64xf32>
    %cst_114 = arith.constant 0.797884583 : f32
    %250 = vector.broadcast %cst_114 : f32 to vector<16x64xf32>
    %251 = arith.mulf %250, %249 : vector<16x64xf32>
    %252 = math.tanh %251 : vector<16x64xf32>
    %cst_115 = arith.constant 1.000000e+00 : f32
    %253 = vector.broadcast %cst_115 : f32 to vector<16x64xf32>
    %254 = arith.addf %253, %252 : vector<16x64xf32>
    %cst_116 = arith.constant 5.000000e-01 : f32
    %255 = vector.broadcast %cst_116 : f32 to vector<16x64xf32>
    %256 = arith.mulf %255, %254 : vector<16x64xf32>
    %257 = arith.mulf %244, %256 : vector<16x64xf32>
    %c1_117 = arith.constant 1 : index
    %c0_118 = arith.constant 0 : index
    %c0_119 = arith.constant 0 : index
    %258 = vector.load %arg13[%c1_117, %c0_118, %c0_119] : memref<2x64x32xf32, #tpu.memory_space<vmem>>, vector<1x64x32xf32>
    %259 = vector.shape_cast %258 : vector<1x64x32xf32> to vector<64x32xf32>
    %cst_120 = arith.constant dense<0.000000e+00> : vector<16x32xf32>
    %260 = tpu.matmul %257, %259, %cst_120 {dimension_numbers = #tpu.dot_dimension_numbers<[1], [0], [0], [1], [0, 0, 1, 1], [], []>} : vector<16x64xf32>, vector<64x32xf32>, vector<16x32xf32> -> vector<16x32xf32>
    %c1_121 = arith.constant 1 : index
    %c0_122 = arith.constant 0 : index
    %c0_123 = arith.constant 0 : index
    %261 = vector.load %arg14[%c1_121, %c0_122, %c0_123] : memref<2x1x32xf32, #tpu.memory_space<vmem>>, vector<1x1x32xf32>
    %262 = vector.shape_cast %261 : vector<1x1x32xf32> to vector<1x32xf32>
    %263 = vector.broadcast %262 : vector<1x32xf32> to vector<16x32xf32>
    %264 = arith.addf %260, %263 : vector<16x32xf32>
    %265 = arith.addf %237, %264 : vector<16x32xf32>
    %c1_124 = arith.constant 1 : index
    %c0_125 = arith.constant 0 : index
    %c0_126 = arith.constant 0 : index
    %266 = vector.load %arg15[%c1_124, %c0_125, %c0_126] : memref<2x1x32xf32, #tpu.memory_space<vmem>>, vector<1x1x32xf32>
    %267 = vector.shape_cast %266 : vector<1x1x32xf32> to vector<1x32xf32>
    %c1_127 = arith.constant 1 : index
    %c0_128 = arith.constant 0 : index
    %c0_129 = arith.constant 0 : index
    %268 = vector.load %arg16[%c1_127, %c0_128, %c0_129] : memref<2x1x32xf32, #tpu.memory_space<vmem>>, vector<1x1x32xf32>
    %269 = vector.shape_cast %268 : vector<1x1x32xf32> to vector<1x32xf32>
    %cst_130 = arith.constant dense<0.000000e+00> : vector<16xf32>
    %270 = vector.multi_reduction <add>, %265, %cst_130 [1] : vector<16x32xf32> to vector<16xf32>
    %271 = vector.shape_cast %270 : vector<16xf32> to vector<16x1xf32>
    %cst_131 = arith.constant 3.200000e+01 : f32
    %272 = vector.broadcast %cst_131 : f32 to vector<16x1xf32>
    %273 = arith.divf %271, %272 : vector<16x1xf32>
    %274 = vector.broadcast %273 : vector<16x1xf32> to vector<16x32xf32>
    %275 = arith.subf %265, %274 : vector<16x32xf32>
    %276 = arith.mulf %275, %275 : vector<16x32xf32>
    %cst_132 = arith.constant dense<0.000000e+00> : vector<16xf32>
    %277 = vector.multi_reduction <add>, %276, %cst_132 [1] : vector<16x32xf32> to vector<16xf32>
    %278 = vector.shape_cast %277 : vector<16xf32> to vector<16x1xf32>
    %cst_133 = arith.constant 3.200000e+01 : f32
    %279 = vector.broadcast %cst_133 : f32 to vector<16x1xf32>
    %280 = arith.divf %278, %279 : vector<16x1xf32>
    %cst_134 = arith.constant 9.99999974E-6 : f32
    %281 = vector.broadcast %cst_134 : f32 to vector<16x1xf32>
    %282 = arith.addf %280, %281 : vector<16x1xf32>
    %283 = math.rsqrt %282 : vector<16x1xf32>
    %284 = vector.broadcast %283 : vector<16x1xf32> to vector<16x32xf32>
    %285 = arith.mulf %275, %284 : vector<16x32xf32>
    %286 = vector.broadcast %267 : vector<1x32xf32> to vector<16x32xf32>
    %287 = arith.mulf %285, %286 : vector<16x32xf32>
    %288 = vector.broadcast %269 : vector<1x32xf32> to vector<16x32xf32>
    %289 = arith.addf %287, %288 : vector<16x32xf32>
    %c0_135 = arith.constant 0 : index
    %c0_136 = arith.constant 0 : index
    %290 = vector.load %arg2[%c0_135, %c0_136] : memref<2x16xf32, #tpu.memory_space<vmem>>, vector<2x16xf32>
    %cst_137 = arith.constant dense<0.000000e+00> : vector<2x32xf32>
    %291 = tpu.matmul %290, %289, %cst_137 {dimension_numbers = #tpu.dot_dimension_numbers<[1], [0], [0], [1], [0, 0, 1, 1], [], []>} : vector<2x16xf32>, vector<16x32xf32>, vector<2x32xf32> -> vector<2x32xf32>
    %c0_138 = arith.constant 0 : index
    %c0_139 = arith.constant 0 : index
    %292 = vector.load %arg17[%c0_138, %c0_139] : memref<32x128xf32, #tpu.memory_space<vmem>>, vector<32x128xf32>
    %cst_140 = arith.constant dense<0.000000e+00> : vector<2x128xf32>
    %293 = tpu.matmul %291, %292, %cst_140 {dimension_numbers = #tpu.dot_dimension_numbers<[1], [0], [0], [1], [0, 0, 1, 1], [], []>} : vector<2x32xf32>, vector<32x128xf32>, vector<2x128xf32> -> vector<2x128xf32>
    %c0_141 = arith.constant 0 : index
    %c0_142 = arith.constant 0 : index
    %294 = vector.load %arg18[%c0_141, %c0_142] : memref<2x128xf32, #tpu.memory_space<vmem>>, vector<2x128xf32>
    tpu.vector_store %arg18[%c0_141, %c0_142], %293 {strides = array<i32>} : memref<2x128xf32, #tpu.memory_space<vmem>>, vector<2x128xf32>,
    return
  }
}

</mosaic_0001>

<bundles_post_ra>
// kernel: _forward_core.1
= control target key start
LH: loop header
LB: loop body
LE: loop exit
PB: predicated region body
PF: predicated region fallthrough
CT: control target
= control target key end

     0   :  { %s3634_s0 = inlined_call_operand.vmem [shape: f32[16,32], index: 0, kind: input, shape index: {}]   ;;  %s3635_s1 = inlined_call_operand.vmem [shape: f32[2,1,8], index: 1, kind: input, shape index: {}]   ;;  %s3636_s2 = inlined_call_operand.vmem [shape: f32[2,16], index: 2, kind: input, shape index: {}]   ;;  %s3637_s3 = inlined_call_operand.vmem [shape: f32[1,32], index: 3, kind: input, shape index: {}]   ;;  %s3638_s4 = inlined_call_operand.vmem [shape: f32[1,32], index: 4, kind: input, shape index: {}]   ;;  %s3639_s5 = inlined_call_operand.vmem [shape: f32[2,32,96], index: 5, kind: input, shape index: {}]   ;;  %s3640_s6 = inlined_call_operand.vmem [shape: f32[2,1,96], index: 6, kind: input, shape index: {}]   ;;  %s3641_s7 = inlined_call_operand.vmem [shape: f32[2,32,32], index: 7, kind: input, shape index: {}]   ;;  %s3642_s8 = inlined_call_operand.vmem [shape: f32[2,1,32], index: 8, kind: input, shape index: {}]   ;;  %s3643_s9 = inlined_call_operand.vmem [shape: f32[2,1,32], index: 9, kind: input, shape index: {}]   ;;  %s3644_s10 = inlined_call_operand.vmem [shape: f32[2,1,32], index: 10, kind: input, shape index: {}]   ;;  %s3645_s11 = inlined_call_operand.vmem [shape: f32[2,32,64], index: 11, kind: input, shape index: {}]   ;;  %s3646_s12 = inlined_call_operand.vmem [shape: f32[2,1,64], index: 12, kind: input, shape index: {}]   ;;  %s3647_s13 = inlined_call_operand.vmem [shape: f32[2,64,32], index: 13, kind: input, shape index: {}]   ;;  %s3648_s14 = inlined_call_operand.vmem [shape: f32[2,1,32], index: 14, kind: input, shape index: {}]   ;;  %s3649_s15 = inlined_call_operand.vmem [shape: f32[2,1,32], index: 15, kind: input, shape index: {}]   ;;  %s3650_s16 = inlined_call_operand.vmem [shape: f32[2,1,32], index: 16, kind: input, shape index: {}]   ;;  %s3651_s17 = inlined_call_operand.vmem [shape: f32[32,128], index: 17, kind: input, shape index: {}]   ;;  %s3652_s18 = inlined_call_operand.hbm [shape: f32[2,128], index: 18, kind: output, shape index: {}]  }
   0x1   :  { %3655 = sst [smem:[#allocation5_spill]] %s3634_s0 }
   0x2   :  { %3656 = sst [smem:[#allocation6_spill]] %s3635_s1 }
   0x3   :  { %3657 = sst [smem:[#allocation7_spill]] %s3636_s2 }
   0x4   :  { %s3658_s29 = sld [smem:[#allocation5_spill]]  ;;  %vm64_vm0 = vcmask 261120  }
   0xa   :  { %v60_v0 = vld [vmem:[%s3658_s29] sm:$0xff]  ;;  %v61_v1 = vld [vmem:[%s3658_s29 + $0x8] sm:$0xff] }
   0xb   :  { %23 = vsyncpa [#allocation3], 0  ;;  %v65_v2 = vsel %vm64_vm0, %v60_v0, 0.0  ;;  %v68_v3 = vsel %vm64_vm0, %v61_v1, 0.0  ;;  %v113_v14 = vld [vmem:[%s3639_s5 + $0x18] sm:$0xff]  ;;  %v112_v15 = vld [vmem:[%s3639_s5 + $0x10] sm:$0xff] }
   0xc   :  { %66 = vadd.xlane.f32.xlu0 %v65_v2  ;;  %2789 = vmatprep.subr.mxu0 %v113_v14  ;;  %v111_v16 = vld [vmem:[%s3639_s5 + $0x8] sm:$0xff]  ;;  %v110_v17 = vld [vmem:[%s3639_s5] sm:$0xff]  ;;  %v3082_v34 = vmov 0.0   ;;  %vm3083_vm1 = vmmov 0   ;;  %s3084_s29 = smov 96   ;;  %vm217_vm2 = vcmask 130048  }
   0xd   :  { %2790 = vmatpush3.msra.mxu0 %v113_v14  ;;  %v2603_v25 = vld [vmem:[%s3637_s3] ss:$0 sm:$0xff]  ;;  %2800 = vmatprep.subr.mxu1 %v3082_v34  ;;  %s3659_s19 = sld [smem:[#allocation6_spill]]  ;;  %vm369_vm3 = vcmask 64512   ;;  %s3085_s21 = smov 64   ;;  %vm1147_vm4 = vcmask 523264  }
   0xe   :  { %2791 = vmatprep.subr.mxu0 %v112_v15  ;;  %v2604_v27 = vld [vmem:[%s3638_s4] ss:$0 sm:$0xff]  ;;  %2802 = vmatprep.mubr.msk.f32.mxu1 %vm3083_vm1, %v3082_v34  ;;  %s3086_s22 = smov 80   ;;  %s3087_s2 = smov 112  }
   0xf   :  { %2792 = vmatpush3.msra.mxu0 %v112_v15  ;;  %v2605_v35 = vld [vmem:[%s3640_s6] ss:$0 sm:$0xff]  ;;  %s3088_s23 = smov 48   ;;  %s3089_s0 = smov 16  }
  0x10   :  { %69 = vadd.xlane.f32.xlu0 %v68_v3  ;;  %2793 = vmatprep.subr.mxu0 %v111_v16 }
  0x11   :  { %2794 = vmatpush3.msra.mxu0 %v111_v16 }
  0x12   :  { %2795 = vmatprep.subr.mxu0 %v110_v17 }
  0x13   :  { %2796 = vmatpush3.msra.mxu0 %v110_v17  ;;  %v3254_v42 = vld [vmem:[%s3659_s19] ss:$0 sm:$0xff]  ;;  %v3260_v46 = vld [vmem:[%s3659_s19 + $0x1] ss:$0 sm:$0xff] }
  0x14   :  { %2810 = vmatprep.subr.mxu0 %v3082_v34 }
  0x95   :  { %v67_v4 = vpop.xlane.xlu0 %66 }
  0x96   :  { %v72_v5 = vmul.f32 0.03125, %v67_v4 }
  0x98   :  { %v74_v6 = vsub.f32 %v60_v0, %v72_v5 }
  0x99   :  { %v70_v7 = vpop.xlane.xlu0 %69 }
  0x9a   :  { %v73_v8 = vmul.f32 0.03125, %v70_v7  ;;  %v76_v9 = vmul.f32 %v74_v6, %v74_v6 }
  0x9c   :  { %v75_v10 = vsub.f32 %v61_v1, %v73_v8  ;;  %v78_v11 = vsel %vm64_vm0, %v76_v9, 0.0 }
  0x9d   :  { %79 = vadd.xlane.f32.xlu1 %v78_v11 }
  0x9e   :  { %v77_v12 = vmul.f32 %v75_v10, %v75_v10 }
  0xa0   :  { %v81_v13 = vsel %vm64_vm0, %v77_v12, 0.0 }
  0xa1   :  { %82 = vadd.xlane.f32.xlu1 %v81_v13 }
 0x126   :  { %v80_v18 = vpop.xlane.xlu1 %79 }
 0x127   :  { %v84_v19 = vmul.f32 0.03125, %v80_v18 }
 0x129   :  { %v86_v20 = vadd.f32 1e-05, %v84_v19 }
 0x12a   :  { %v83_v21 = vpop.xlane.xlu1 %82 }
 0x12b   :  { %3000 = vrsqrt.f32 %v86_v20  ;;  %v85_v22 = vmul.f32 0.03125, %v83_v21 }
 0x12d   :  { %v87_v23 = vadd.f32 1e-05, %v85_v22 }
 0x12f   :  { %3002 = vrsqrt.f32 %v87_v23 }
 0x138   :  { %v3001_v24 = vpop.eup %3000 }
 0x139   :  { %v90_v26 = vmul.f32 %v3001_v24, %v74_v6 }
 0x13b   :  { %v98_v28 = vmul.f32 %v2603_v25, %v90_v26 }
 0x13c   :  { %v3003_v29 = vpop.eup %3002 }
 0x13d   :  { %v91_v30 = vmul.f32 %v3003_v29, %v75_v10  ;;  %v3214_v31 = vadd.f32 %v2604_v27, %v98_v28 }
 0x13f   :  { %v99_v32 = vmul.f32 %v2603_v25, %v91_v30  ;;  %2797 = vmatprep.mubr.msk.f32.mxu0 %vm64_vm0, %v3214_v31 }
 0x141   :  { %v3218_v33 = vadd.f32 %v2604_v27, %v99_v32 }
 0x143   :  { %2798 = vmatmul.mubr.msk.f32.vlgmr.msra.gmra.mxu0 %vm64_vm0, %v3218_v33 }
 0x144   :  { %2812 = vmatprep.mubr.msk.f32.mxu0 %vm3083_vm1, %v3082_v34 }
 0x203   :  { %v2799_v36 = vpop.f32.mrf.mxu0 }
 0x204   :  { %v3231_v37 = vadd.f32 %v2799_v36, %v2605_v35 }
 0x205   :  { %v193_v38 = vpop.f32.mrf.mxu0 }
 0x206   :  { %v3233_v39 = vadd.f32 %v2605_v35, %v193_v38  ;;  %293 = vrot.lane.b32.xlu1 %v3231_v37, %s3084_s29 }
 0x208   :  { %215 = vrot.lane.b32.xlu0 %v3233_v39, %s3084_s29 }
 0x278   :  { %v294_v41 = vpop.permute.xlu1 %293 }
 0x27a   :  { %v216_v40 = vpop.permute.xlu0 %215 }
 0x27b   :  { %2801 = vmatpush3.xpose.msk.msra.mxu1 %vm217_vm2, %v216_v40 }
 0x27c   :  { %2805 = vmatprep.subr.mxu1 %v3082_v34 }
 0x27e   :  { %2803 = vmatmul.mubr.msk.f32.vlgmr.msra.gmra.mxu1 %vm217_vm2, %v3233_v39 }
 0x27f   :  { %2806 = vmatpush3.xpose.msk.msra.mxu1 %vm217_vm2, %v294_v41  ;;  %2807 = vmatprep.mubr.msk.f32.mxu1 %vm3083_vm1, %v3082_v34 }
 0x280   :  { %2815 = vmatprep.subr.mxu1 %v3082_v34 }
 0x282   :  { %2808 = vmatmul.mubr.msk.f32.vlgmr.msra.gmra.mxu1 %vm217_vm2, %v3231_v37 }
 0x283   :  { %2817 = vmatprep.mubr.msk.f32.mxu1 %vm3083_vm1, %v3082_v34 }
 0x33e   :  { %v288_v43 = vpop.f32.mrf.mxu1 }
 0x33f   :  { %v289_v44 = vadd.f32 %v3254_v42, %v288_v43 }
 0x340   :  { %v2804_v45 = vpop.f32.mrf.mxu1 }
 0x341   :  { %v370_v47 = vsel %vm369_vm3, %v289_v44, -inf  ;;  %v887_v45 = vld [vmem:[%s3641_s7 + $0x18] sm:$0xff] }
 0x342   :  { %371 = vmax.xlane.f32.xlu1 %v370_v47  ;;  %v365_v48 = vpop.f32.mrf.mxu1  ;;  %v885_v47 = vld [vmem:[%s3641_s7 + $0x8] sm:$0xff] }
 0x343   :  { %v366_v49 = vadd.f32 %v3260_v46, %v365_v48  ;;  %v884_v48 = vld [vmem:[%s3641_s7] sm:$0xff] }
 0x344   :  { %v2809_v50 = vpop.f32.mrf.mxu1 }
 0x345   :  { %v373_v51 = vsel %vm369_vm3, %v366_v49, -inf }
 0x346   :  { %374 = vmax.xlane.f32.xlu0 %v373_v51 }
 0x353   :  { %468 = vrot.lane.b32.xlu1 %v3231_v37, %s3085_s21 }
 0x357   :  { %546 = vrot.lane.b32.xlu1 %v3233_v39, %s3086_s22 }
 0x35b   :  { %624 = vrot.lane.b32.xlu1 %v3231_v37, %s3086_s22 }
 0x3cb   :  { %v372_v52 = vpop.xlane.xlu1 %371 }
 0x3cc   :  { %v376_v53 = vsub.f32 %v289_v44, %v372_v52 }
 0x3ce   :  { %v378_v54 = vmul.f32 1.442695, %v376_v53 }
 0x3cf   :  { %v469_v55 = vpop.permute.xlu1 %468  ;;  %v375_v56 = vpop.xlane.xlu0 %374 }
 0x3d0   :  { %3004 = vpow2.f32 %v378_v54  ;;  %v377_v57 = vsub.f32 %v366_v49, %v375_v56  ;;  %2816 = vmatpush3.msra.mxu1 %v469_v55 }
 0x3d1   :  { %2825 = vmatprep.subr.mxu1 %v3082_v34 }
 0x3d2   :  { %v380_v58 = vmul.f32 1.442695, %v377_v57  ;;  %v2622_v57 = vld [vmem:[%s3642_s8] ss:$0 sm:$0xff] }
 0x3d3   :  { %v547_v63 = vpop.permute.xlu1 %546 }
 0x3d4   :  { %3006 = vpow2.f32 %v380_v58 }
 0x3d7   :  { %v625_v0 = vpop.permute.xlu1 %624 }
 0x3dd   :  { %v3005_v59 = vpop.eup %3004 }
 0x3de   :  { %v382_v60 = vsel %vm369_vm3, %v3005_v59, 0.0 }
 0x3df   :  { %383 = vadd.xlane.f32.xlu0 %v382_v60 }
 0x3e1   :  { %v3007_v61 = vpop.eup %3006 }
 0x3e2   :  { %v385_v62 = vsel %vm369_vm3, %v3007_v61, 0.0 }
 0x3e3   :  { %386 = vadd.xlane.f32.xlu1 %v385_v62 }
 0x3f4   :  { %622 = vrot.lane.b32.xlu1 %v3231_v37, %s3087_s2 }
 0x3f5   :  { %392 = vrot.lane.b32.xlu0 %v3233_v39, %s3085_s21 }
 0x3f9   :  { %544 = vrot.lane.b32.xlu0 %v3233_v39, %s3087_s2 }
 0x468   :  { %v384_v1 = vpop.xlane.xlu0 %383 }
 0x469   :  { %3008 = vrcp.f32 %v384_v1 }
 0x46c   :  { %v387_v2 = vpop.xlane.xlu1 %386  ;;  %v393_v3 = vpop.permute.xlu0 %392 }
 0x46d   :  { %3010 = vrcp.f32 %v387_v2  ;;  %2811 = vmatpush3.msra.mxu0 %v393_v3 }
 0x46e   :  { %2820 = vmatprep.subr.mxu0 %v3082_v34 }
 0x470   :  { %v545_v8 = vpop.permute.xlu0 %544  ;;  %v623_v9 = vpop.permute.xlu1 %622 }
 0x476   :  { %v3009_v4 = vpop.eup %3008 }
 0x477   :  { %v390_v5 = vmul.f32 %v3009_v4, %v3005_v59 }
 0x479   :  { %2813 = vmatmul.mubr.msk.f32.vlgmr.msra.gmra.mxu0 %vm369_vm3, %v390_v5 }
 0x47a   :  { %v3011_v6 = vpop.eup %3010  ;;  %2821 = vmatpush3.xpose.msk.msra.mxu0 %vm217_vm2, %v547_v63  ;;  %2822 = vmatprep.mubr.msk.f32.mxu0 %vm3083_vm1, %v3082_v34 }
 0x47b   :  { %v391_v7 = vmul.f32 %v3011_v6, %v3007_v61  ;;  %2830 = vmatprep.subr.mxu0 %v3082_v34 }
 0x47d   :  { %2818 = vmatmul.mubr.msk.f32.vlgmr.msra.gmra.mxu1 %vm369_vm3, %v391_v7  ;;  %2823 = vmatmul.mubr.msk.f32.vlgmr.msra.gmra.mxu0 %vm217_vm2, %v545_v8 }
 0x47e   :  { %2826 = vmatpush3.xpose.msk.msra.mxu1 %vm217_vm2, %v625_v0  ;;  %2827 = vmatprep.mubr.msk.f32.mxu1 %vm3083_vm1, %v3082_v34 }
 0x47f   :  { %2835 = vmatprep.subr.mxu1 %v3082_v34  ;;  %2832 = vmatprep.mubr.msk.f32.mxu0 %vm3083_vm1, %v3082_v34 }
 0x481   :  { %2828 = vmatmul.mubr.msk.f32.vlgmr.msra.gmra.mxu1 %vm217_vm2, %v623_v9 }
 0x482   :  { %2837 = vmatprep.mubr.msk.f32.mxu1 %vm3083_vm1, %v3082_v34 }
 0x539   :  { %v3297_v10 = vpop.f32.mrf.mxu0 }
 0x53b   :  { %v2814_v11 = vpop.f32.mrf.mxu0 }
 0x53c   :  { %v1024_v11 = vld [vmem:[%s3645_s11 + $0x10] sm:$0xff] }
 0x53d   :  { %v3299_v12 = vpop.f32.mrf.mxu1  ;;  %v618_v13 = vpop.f32.mrf.mxu0 }
 0x53e   :  { %v619_v14 = vadd.f32 %v3254_v42, %v618_v13  ;;  %v1022_v13 = vld [vmem:[%s3645_s11] sm:$0xff] }
 0x53f   :  { %v2819_v15 = vpop.f32.mrf.mxu1  ;;  %v2824_v16 = vpop.f32.mrf.mxu0 }
 0x540   :  { %v700_v17 = vsel %vm369_vm3, %v619_v14, -inf }
 0x541   :  { %701 = vmax.xlane.f32.xlu0 %v700_v17  ;;  %v696_v18 = vpop.f32.mrf.mxu1 }
 0x542   :  { %v697_v19 = vadd.f32 %v3260_v46, %v696_v18 }
 0x543   :  { %v2829_v20 = vpop.f32.mrf.mxu1 }
 0x544   :  { %v703_v21 = vsel %vm369_vm3, %v697_v19, -inf }
 0x545   :  { %704 = vmax.xlane.f32.xlu1 %v703_v21  ;;  %v2625_v21 = vld [vmem:[%s3643_s9] ss:$0 sm:$0xff] }
 0x556   :  { %798 = vrot.lane.b32.xlu1 %v3231_v37, %s3088_s23 }
 0x5ca   :  { %v702_v22 = vpop.xlane.xlu0 %701 }
 0x5cb   :  { %v706_v23 = vsub.f32 %v619_v14, %v702_v22 }
 0x5cd   :  { %v708_v24 = vmul.f32 1.442695, %v706_v23  ;;  %v2626_v23 = vld [vmem:[%s3644_s10] ss:$0 sm:$0xff] }
 0x5ce   :  { %v705_v25 = vpop.xlane.xlu1 %704 }
 0x5cf   :  { %3012 = vpow2.f32 %v708_v24  ;;  %v707_v26 = vsub.f32 %v697_v19, %v705_v25 }
 0x5d1   :  { %v710_v27 = vmul.f32 1.442695, %v707_v26 }
 0x5d2   :  { %v799_v28 = vpop.permute.xlu1 %798 }
 0x5d3   :  { %3014 = vpow2.f32 %v710_v27  ;;  %2836 = vmatpush3.msra.mxu1 %v799_v28 }
 0x5dc   :  { %v3013_v29 = vpop.eup %3012 }
 0x5dd   :  { %v712_v30 = vsel %vm369_vm3, %v3013_v29, 0.0 }
 0x5de   :  { %713 = vadd.xlane.f32.xlu0 %v712_v30  ;;  %v1139_v30 = vld [vmem:[%s3647_s13 + $0x38] sm:$0xff] }
 0x5e0   :  { %v3015_v32 = vpop.eup %3014 }
 0x5e1   :  { %v715_v35 = vsel %vm369_vm3, %v3015_v32, 0.0 }
 0x5e2   :  { %716 = vadd.xlane.f32.xlu0 %v715_v35  ;;  %v1137_v35 = vld [vmem:[%s3647_s13 + $0x28] sm:$0xff] }
 0x5f8   :  { %722 = vrot.lane.b32.xlu0 %v3233_v39, %s3088_s23  ;;  %v886_v39 = vld [vmem:[%s3641_s7 + $0x10] sm:$0xff] }
 0x667   :  { %v714_v36 = vpop.xlane.xlu0 %713 }
 0x668   :  { %3016 = vrcp.f32 %v714_v36  ;;  %v1136_v36 = vld [vmem:[%s3647_s13 + $0x20] sm:$0xff] }
 0x66b   :  { %v717_v37 = vpop.xlane.xlu0 %716 }
 0x66c   :  { %3018 = vrcp.f32 %v717_v37  ;;  %v1135_v37 = vld [vmem:[%s3647_s13 + $0x18] sm:$0xff] }
 0x66f   :  { %v723_v38 = vpop.permute.xlu0 %722 }
 0x670   :  { %2831 = vmatpush3.msra.mxu0 %v723_v38  ;;  %v1134_v38 = vld [vmem:[%s3647_s13 + $0x10] sm:$0xff] }
 0x671   :  { %2840 = vmatprep.subr.mxu0 %v887_v45 }
 0x675   :  { %v3017_v40 = vpop.eup %3016 }
 0x676   :  { %v720_v41 = vmul.f32 %v3017_v40, %v3013_v29  ;;  %v1133_v40 = vld [vmem:[%s3647_s13 + $0x8] sm:$0xff] }
 0x678   :  { %2833 = vmatmul.mubr.msk.f32.vlgmr.msra.gmra.mxu0 %vm369_vm3, %v720_v41  ;;  %v1132_v41 = vld [vmem:[%s3647_s13] sm:$0xff] }
 0x679   :  { %v3019_v43 = vpop.eup %3018  ;;  %2841 = vmatpush3.msra.mxu0 %v887_v45 }
 0x67a   :  { %v721_v44 = vmul.f32 %v3019_v43, %v3015_v32  ;;  %2842 = vmatprep.subr.mxu0 %v886_v39  ;;  %v1138_v32 = vld [vmem:[%s3647_s13 + $0x30] sm:$0xff]  ;;  %v2627_v43 = vld [vmem:[%s3646_s12] ss:$0 sm:$0xff] }
 0x67b   :  { %2843 = vmatpush3.msra.mxu0 %v886_v39 }
 0x67c   :  { %2838 = vmatmul.mubr.msk.f32.vlgmr.msra.gmra.mxu1 %vm369_vm3, %v721_v44  ;;  %2844 = vmatprep.subr.mxu0 %v885_v47 }
 0x67d   :  { %2845 = vmatpush3.msra.mxu0 %v885_v47 }
 0x67e   :  { %2846 = vmatprep.subr.mxu0 %v884_v48 }
 0x67f   :  { %2847 = vmatpush3.msra.mxu0 %v884_v48 }
 0x680   :  { %2862 = vmatprep.subr.mxu0 %v1139_v30 }
 0x738   :  { %v794_v49 = vpop.f32.mrf.mxu0 }
 0x739   :  { %876 = vrot.lane.b32.xlu1 %v794_v49, %s3089_s0 }
 0x73a   :  { %v2834_v50 = vpop.f32.mrf.mxu0 }
 0x73c   :  { %v870_v51 = vpop.f32.mrf.mxu1 }
 0x73d   :  { %878 = vrot.lane.b32.xlu1 %v870_v51, %s3089_s0 }
 0x73e   :  { %v2839_v52 = vpop.f32.mrf.mxu1 }
 0x7ab   :  { %v877_v53 = vpop.permute.xlu1 %876 }
 0x7ac   :  { %v882_v54 = vsel %vm217_vm2, %v3297_v10, %v877_v53 }
 0x7ad   :  { %2848 = vmatprep.mubr.msk.f32.mxu0 %vm64_vm0, %v882_v54 }
 0x7af   :  { %v879_v55 = vpop.permute.xlu1 %878 }
 0x7b0   :  { %v883_v56 = vsel %vm217_vm2, %v3299_v12, %v879_v55  ;;  %v1023_v12 = vld [vmem:[%s3645_s11 + $0x8] sm:$0xff] }
 0x7b1   :  { %2849 = vmatmul.mubr.msk.f32.vlgmr.msra.gmra.mxu0 %vm64_vm0, %v883_v56 }
 0x7b2   :  { %2863 = vmatpush3.msra.mxu0 %v1139_v30  ;;  %v2633_v30 = vld [vmem:[%s3649_s15] ss:$0 sm:$0xff] }
 0x7b3   :  { %2864 = vmatprep.subr.mxu0 %v1138_v32 }
 0x7b4   :  { %2865 = vmatpush3.msra.mxu0 %v1138_v32 }
 0x7b5   :  { %2866 = vmatprep.subr.mxu0 %v1137_v35 }
 0x7b6   :  { %2867 = vmatpush3.msra.mxu0 %v1137_v35 }
 0x7b7   :  { %2868 = vmatprep.subr.mxu0 %v1136_v36 }
 0x7b8   :  { %2869 = vmatpush3.msra.mxu0 %v1136_v36 }
 0x7b9   :  { %2870 = vmatprep.subr.mxu0 %v1135_v37 }
 0x7ba   :  { %2871 = vmatpush3.msra.mxu0 %v1135_v37 }
 0x7bb   :  { %2872 = vmatprep.subr.mxu0 %v1134_v38 }
 0x7bc   :  { %2873 = vmatpush3.msra.mxu0 %v1134_v38  ;;  %v2634_v38 = vld [vmem:[%s3650_s16] ss:$0 sm:$0xff] }
 0x7bd   :  { %2874 = vmatprep.subr.mxu0 %v1133_v40 }
 0x7be   :  { %2875 = vmatpush3.msra.mxu0 %v1133_v40 }
 0x7bf   :  { %2876 = vmatprep.subr.mxu0 %v1132_v41 }
 0x7c0   :  { %2877 = vmatpush3.msra.mxu0 %v1132_v41 }
 0x7c1   :  { %2902 = vmatprep.subr.mxu0 %v3082_v34 }
 0x871   :  { %v2850_v58 = vpop.f32.mrf.mxu0 }
 0x872   :  { %v973_v59 = vadd.f32 %v2850_v58, %v2622_v57 }
 0x873   :  { %v967_v60 = vpop.f32.mrf.mxu0 }
 0x874   :  { %v968_v61 = vadd.f32 %v2622_v57, %v967_v60  ;;  %v977_v62 = vadd.f32 %v973_v59, %v3218_v33 }
 0x876   :  { %v983_v63 = vsel %vm64_vm0, %v977_v62, 0.0  ;;  %v976_v0 = vadd.f32 %v968_v61, %v3214_v31  ;;  %v1025_v31 = vld [vmem:[%s3645_s11 + $0x18] sm:$0xff] }
 0x877   :  { %984 = vadd.xlane.f32.xlu1 %v983_v63  ;;  %2851 = vmatprep.subr.mxu1 %v1025_v31 }
 0x878   :  { %v980_v1 = vsel %vm64_vm0, %v976_v0, 0.0  ;;  %2852 = vmatpush3.msra.mxu1 %v1025_v31 }
 0x879   :  { %981 = vadd.xlane.f32.xlu0 %v980_v1  ;;  %2853 = vmatprep.subr.mxu1 %v1024_v11 }
 0x87a   :  { %2854 = vmatpush3.msra.mxu1 %v1024_v11 }
 0x87b   :  { %2855 = vmatprep.subr.mxu1 %v1023_v12 }
 0x87c   :  { %2856 = vmatpush3.msra.mxu1 %v1023_v12 }
 0x87d   :  { %2857 = vmatprep.subr.mxu1 %v1022_v13 }
 0x87e   :  { %2858 = vmatpush3.msra.mxu1 %v1022_v13 }
 0x900   :  { %v985_v2 = vpop.xlane.xlu1 %984 }
 0x901   :  { %v987_v3 = vmul.f32 0.03125, %v985_v2  ;;  %v2630_v2 = vld [vmem:[%s3648_s14] ss:$0 sm:$0xff] }
 0x902   :  { %v982_v4 = vpop.xlane.xlu0 %981 }
 0x903   :  { %v986_v5 = vmul.f32 0.03125, %v982_v4  ;;  %v989_v6 = vsub.f32 %v977_v62, %v987_v3 }
 0x905   :  { %v988_v7 = vsub.f32 %v976_v0, %v986_v5  ;;  %v991_v10 = vmul.f32 %v989_v6, %v989_v6 }
 0x907   :  { %v990_v8 = vmul.f32 %v988_v7, %v988_v7  ;;  %v995_v33 = vsel %vm64_vm0, %v991_v10, 0.0 }
 0x909   :  { %v992_v9 = vsel %vm64_vm0, %v990_v8, 0.0 }
 0x90a   :  { %993 = vadd.xlane.f32.xlu0 %v992_v9 }
 0x90e   :  { %996 = vadd.xlane.f32.xlu0 %v995_v33 }
 0x993   :  { %v994_v14 = vpop.xlane.xlu0 %993 }
 0x994   :  { %v998_v15 = vmul.f32 0.03125, %v994_v14 }
 0x996   :  { %v1000_v16 = vadd.f32 1e-05, %v998_v15 }
 0x997   :  { %v997_v17 = vpop.xlane.xlu0 %996 }
 0x998   :  { %3020 = vrsqrt.f32 %v1000_v16  ;;  %v999_v18 = vmul.f32 0.03125, %v997_v17 }
 0x99a   :  { %v1001_v19 = vadd.f32 1e-05, %v999_v18 }
 0x99c   :  { %3022 = vrsqrt.f32 %v1001_v19  ;;  %v2638_v19 = vld [vmem:[%s3639_s5 + $0x38] sm:$0xff] }
 0x99d   :  { %2881 = vmatprep.subr.mxu1 %v2638_v19 }
 0x9a5   :  { %v3021_v20 = vpop.eup %3020 }
 0x9a6   :  { %v1004_v22 = vmul.f32 %v3021_v20, %v988_v7  ;;  %v2637_v20 = vld [vmem:[%s3639_s5 + $0x30] sm:$0xff] }
 0x9a8   :  { %v1012_v24 = vmul.f32 %v2625_v21, %v1004_v22  ;;  %v2635_v22 = vld [vmem:[%s3639_s5 + $0x20] sm:$0xff] }
 0x9a9   :  { %v3023_v25 = vpop.eup %3022 }
 0x9aa   :  { %v1005_v26 = vmul.f32 %v3023_v25, %v989_v6  ;;  %v3360_v27 = vadd.f32 %v2626_v23, %v1012_v24 }
 0x9ac   :  { %v1013_v28 = vmul.f32 %v2625_v21, %v1005_v26  ;;  %2859 = vmatprep.mubr.msk.f32.mxu1 %vm64_vm0, %v3360_v27  ;;  %v2636_v21 = vld [vmem:[%s3639_s5 + $0x28] sm:$0xff] }
 0x9ae   :  { %v1021_v29 = vadd.f32 %v2626_v23, %v1013_v28 }
 0x9b0   :  { %2860 = vmatmul.mubr.msk.f32.vlgmr.msra.gmra.mxu1 %vm64_vm0, %v1021_v29 }
 0x9b1   :  { %2882 = vmatpush3.msra.mxu1 %v2638_v19 }
 0x9b2   :  { %2883 = vmatprep.subr.mxu1 %v2637_v20 }
 0x9b3   :  { %2884 = vmatpush3.msra.mxu1 %v2637_v20 }
 0x9b4   :  { %2885 = vmatprep.subr.mxu1 %v2636_v21 }
 0x9b5   :  { %2886 = vmatpush3.msra.mxu1 %v2636_v21 }
 0x9b6   :  { %2887 = vmatprep.subr.mxu1 %v2635_v22 }
 0x9b7   :  { %2888 = vmatpush3.msra.mxu1 %v2635_v22 }
 0x9b8   :  { %2892 = vmatprep.subr.mxu1 %v3082_v34 }
 0xa70   :  { %v2861_v44 = vpop.f32.mrf.mxu1 }
 0xa71   :  { %v1111_v45 = vadd.f32 %v2861_v44, %v2627_v43  ;;  %v2640_v44 = vld [vmem:[%s3640_s6 + $0x1] ss:$0 sm:$0xff] }
 0xa72   :  { %v1105_v39 = vpop.f32.mrf.mxu1 }
 0xa73   :  { %v1115_v47 = vmul.f32 %v1111_v45, %v1111_v45  ;;  %v1106_v48 = vadd.f32 %v2627_v43, %v1105_v39 }
 0xa75   :  { %v1117_v49 = vmul.f32 %v1115_v47, %v1111_v45  ;;  %v1114_v50 = vmul.f32 %v1106_v48, %v1106_v48 }
 0xa77   :  { %v1119_v51 = vmul.f32 0.044715, %v1117_v49  ;;  %v1116_v52 = vmul.f32 %v1114_v50, %v1106_v48 }
 0xa79   :  { %v1121_v53 = vadd.f32 %v1119_v51, %v1111_v45  ;;  %v1118_v54 = vmul.f32 0.044715, %v1116_v52 }
 0xa7b   :  { %v1123_v55 = vmul.f32 0.7978846, %v1121_v53  ;;  %v1120_v56 = vadd.f32 %v1118_v54, %v1106_v48 }
 0xa7d   :  { %3024 = vtanh.f32 %v1123_v55  ;;  %v1122_v57 = vmul.f32 0.7978846, %v1120_v56 }
 0xa7f   :  { %3026 = vtanh.f32 %v1122_v57 }
 0xa8a   :  { %v3025_v58 = vpop.eup %3024 }
 0xa8b   :  { %v1127_v59 = vadd.f32 1.0, %v3025_v58 }
 0xa8c   :  { %v3027_v60 = vpop.eup %3026 }
 0xa8d   :  { %v1126_v61 = vadd.f32 1.0, %v3027_v60  ;;  %v1129_v62 = vmul.f32 0.5, %v1127_v59 }
 0xa8f   :  { %v1128_v63 = vmul.f32 0.5, %v1126_v61  ;;  %v1131_v1 = vmul.f32 %v1129_v62, %v1111_v45 }
 0xa91   :  { %v1130_v0 = vmul.f32 %v1128_v63, %v1106_v48 }
 0xa93   :  { %2878 = vmatprep.mubr.msk.f32.mxu0 %vm1147_vm4, %v1130_v0 }
 0xa94   :  { %2879 = vmatmul.mubr.msk.f32.vlgmr.msra.gmra.mxu0 %vm1147_vm4, %v1131_v1 }
 0xa95   :  { %2904 = vmatprep.mubr.msk.f32.mxu0 %vm3083_vm1, %v3082_v34 }
 0xb54   :  { %v2880_v3 = vpop.f32.mrf.mxu0 }
 0xb55   :  { %v1226_v4 = vadd.f32 %v2880_v3, %v2630_v2 }
 0xb56   :  { %v1220_v5 = vpop.f32.mrf.mxu0 }
 0xb57   :  { %v1221_v6 = vadd.f32 %v2630_v2, %v1220_v5  ;;  %v1230_v7 = vadd.f32 %v1226_v4, %v1021_v29 }
 0xb59   :  { %v1236_v8 = vsel %vm64_vm0, %v1230_v7, 0.0  ;;  %v1229_v9 = vadd.f32 %v1221_v6, %v3360_v27 }
 0xb5a   :  { %1237 = vadd.xlane.f32.xlu1 %v1236_v8 }
 0xb5b   :  { %v1233_v10 = vsel %vm64_vm0, %v1229_v9, 0.0 }
 0xb5c   :  { %1234 = vadd.xlane.f32.xlu0 %v1233_v10 }
 0xbe3   :  { %v1238_v33 = vpop.xlane.xlu1 %1237 }
 0xbe4   :  { %v1240_v31 = vmul.f32 0.03125, %v1238_v33 }
 0xbe5   :  { %v1235_v11 = vpop.xlane.xlu0 %1234 }
 0xbe6   :  { %v1242_v12 = vsub.f32 %v1230_v7, %v1240_v31  ;;  %v1239_v13 = vmul.f32 0.03125, %v1235_v11 }
 0xbe8   :  { %v1241_v14 = vsub.f32 %v1229_v9, %v1239_v13  ;;  %v1244_v15 = vmul.f32 %v1242_v12, %v1242_v12 }
 0xbea   :  { %v1248_v16 = vsel %vm64_vm0, %v1244_v15, 0.0  ;;  %v1243_v17 = vmul.f32 %v1241_v14, %v1241_v14 }
 0xbeb   :  { %1249 = vadd.xlane.f32.xlu1 %v1248_v16 }
 0xbec   :  { %v1245_v18 = vsel %vm64_vm0, %v1243_v17, 0.0 }
 0xbed   :  { %1246 = vadd.xlane.f32.xlu0 %v1245_v18 }
 0xc74   :  { %v1250_v23 = vpop.xlane.xlu1 %1249 }
 0xc75   :  { %v1252_v24 = vmul.f32 0.03125, %v1250_v23 }
 0xc76   :  { %v1247_v25 = vpop.xlane.xlu0 %1246 }
 0xc77   :  { %v1254_v26 = vadd.f32 1e-05, %v1252_v24  ;;  %v1251_v27 = vmul.f32 0.03125, %v1247_v25 }
 0xc79   :  { %3028 = vrsqrt.f32 %v1254_v26  ;;  %v1253_v28 = vadd.f32 1e-05, %v1251_v27 }
 0xc7b   :  { %3030 = vrsqrt.f32 %v1253_v28 }
 0xc86   :  { %v3029_v29 = vpop.eup %3028 }
 0xc87   :  { %v1258_v32 = vmul.f32 %v3029_v29, %v1242_v12 }
 0xc88   :  { %v3031_v35 = vpop.eup %3030 }
 0xc89   :  { %v1257_v36 = vmul.f32 %v3031_v35, %v1241_v14  ;;  %v1266_v37 = vmul.f32 %v2633_v30, %v1258_v32 }
 0xc8b   :  { %v1265_v40 = vmul.f32 %v2633_v30, %v1257_v36  ;;  %v3426_v43 = vadd.f32 %v2634_v38, %v1266_v37 }
 0xc8d   :  { %v3424_v41 = vadd.f32 %v2634_v38, %v1265_v40 }
 0xc8f   :  { %2889 = vmatprep.mubr.msk.f32.mxu1 %vm64_vm0, %v3424_v41 }
 0xc90   :  { %2890 = vmatmul.mubr.msk.f32.vlgmr.msra.gmra.mxu1 %vm64_vm0, %v3426_v43 }
 0xc91   :  { %2894 = vmatprep.mubr.msk.f32.mxu1 %vm3083_vm1, %v3082_v34 }
 0xd50   :  { %v2891_v45 = vpop.f32.mrf.mxu1 }
 0xd51   :  { %v3437_v39 = vadd.f32 %v2891_v45, %v2640_v44 }
 0xd52   :  { %v1360_v47 = vpop.f32.mrf.mxu1 }
 0xd53   :  { %v3439_v48 = vadd.f32 %v2640_v44, %v1360_v47  ;;  %1447 = vrot.lane.b32.xlu1 %v3437_v39, %s3084_s29 }
 0xd55   :  { %1370 = vrot.lane.b32.xlu0 %v3439_v48, %s3084_s29 }
 0xdc5   :  { %v1448_v50 = vpop.permute.xlu1 %1447 }
 0xdc7   :  { %v1371_v49 = vpop.permute.xlu0 %1370 }
 0xdc8   :  { %2893 = vmatpush3.xpose.msk.msra.mxu1 %vm217_vm2, %v1371_v49 }
 0xdc9   :  { %2897 = vmatprep.subr.mxu1 %v3082_v34 }
 0xdcb   :  { %2895 = vmatmul.mubr.msk.f32.vlgmr.msra.gmra.mxu1 %vm217_vm2, %v3439_v48 }
 0xdcc   :  { %2898 = vmatpush3.xpose.msk.msra.mxu1 %vm217_vm2, %v1448_v50  ;;  %2899 = vmatprep.mubr.msk.f32.mxu1 %vm3083_vm1, %v3082_v34 }
 0xdcd   :  { %2907 = vmatprep.subr.mxu1 %v3082_v34 }
 0xdcf   :  { %2900 = vmatmul.mubr.msk.f32.vlgmr.msra.gmra.mxu1 %vm217_vm2, %v3437_v39 }
 0xdd0   :  { %2909 = vmatprep.mubr.msk.f32.mxu1 %vm3083_vm1, %v3082_v34 }
 0xe8b   :  { %v1442_v51 = vpop.f32.mrf.mxu1 }
 0xe8c   :  { %v1443_v52 = vadd.f32 %v3254_v42, %v1442_v51  ;;  %v2658_v51 = vld [vmem:[%s3641_s7 + $0x38] sm:$0xff] }
 0xe8d   :  { %v2896_v53 = vpop.f32.mrf.mxu1 }
 0xe8e   :  { %v1523_v54 = vsel %vm369_vm3, %v1443_v52, -inf  ;;  %v2655_v53 = vld [vmem:[%s3641_s7 + $0x20] sm:$0xff] }
 0xe8f   :  { %1524 = vmax.xlane.f32.xlu1 %v1523_v54  ;;  %v1519_v55 = vpop.f32.mrf.mxu1 }
 0xe90   :  { %v1520_v56 = vadd.f32 %v3260_v46, %v1519_v55 }
 0xe91   :  { %v2901_v57 = vpop.f32.mrf.mxu1 }
 0xe92   :  { %v1526_v58 = vsel %vm369_vm3, %v1520_v56, -inf }
 0xe93   :  { %1527 = vmax.xlane.f32.xlu0 %v1526_v58 }
 0xea0   :  { %1621 = vrot.lane.b32.xlu1 %v3437_v39, %s3085_s21 }
 0xea4   :  { %1699 = vrot.lane.b32.xlu1 %v3439_v48, %s3086_s22 }
 0xea8   :  { %1777 = vrot.lane.b32.xlu1 %v3437_v39, %s3086_s22 }
 0xf18   :  { %v1525_v59 = vpop.xlane.xlu1 %1524 }
 0xf19   :  { %v1529_v60 = vsub.f32 %v1443_v52, %v1525_v59  ;;  %v2656_v52 = vld [vmem:[%s3641_s7 + $0x28] sm:$0xff] }
 0xf1b   :  { %v1531_v61 = vmul.f32 1.442695, %v1529_v60 }
 0xf1c   :  { %v1622_v62 = vpop.permute.xlu1 %1621  ;;  %v1528_v63 = vpop.xlane.xlu0 %1527 }
 0xf1d   :  { %3032 = vpow2.f32 %v1531_v61  ;;  %v1530_v0 = vsub.f32 %v1520_v56, %v1528_v63  ;;  %2908 = vmatpush3.msra.mxu1 %v1622_v62  ;;  %v2660_v62 = vld [vmem:[%s3642_s8 + $0x1] ss:$0 sm:$0xff] }
 0xf1e   :  { %2917 = vmatprep.subr.mxu1 %v3082_v34 }
 0xf1f   :  { %v1533_v1 = vmul.f32 1.442695, %v1530_v0 }
 0xf20   :  { %v1700_v6 = vpop.permute.xlu1 %1699 }
 0xf21   :  { %3034 = vpow2.f32 %v1533_v1 }
 0xf24   :  { %v1778_v7 = vpop.permute.xlu1 %1777 }
 0xf2a   :  { %v3033_v2 = vpop.eup %3032 }
 0xf2b   :  { %v1535_v3 = vsel %vm369_vm3, %v3033_v2, 0.0 }
 0xf2c   :  { %1536 = vadd.xlane.f32.xlu0 %v1535_v3 }
 0xf2e   :  { %v3035_v4 = vpop.eup %3034 }
 0xf2f   :  { %v1538_v5 = vsel %vm369_vm3, %v3035_v4, 0.0 }
 0xf30   :  { %1539 = vadd.xlane.f32.xlu1 %v1538_v5 }
 0xf41   :  { %1775 = vrot.lane.b32.xlu1 %v3437_v39, %s3087_s2 }
 0xf42   :  { %1545 = vrot.lane.b32.xlu0 %v3439_v48, %s3085_s21 }
 0xf46   :  { %1697 = vrot.lane.b32.xlu0 %v3439_v48, %s3087_s2  ;;  %s3090_s2 = smov [#allocation2]  }
 0xfb5   :  { %v1537_v8 = vpop.xlane.xlu0 %1536 }
 0xfb6   :  { %3036 = vrcp.f32 %v1537_v8 }
 0xfb9   :  { %v1540_v9 = vpop.xlane.xlu1 %1539  ;;  %v1546_v10 = vpop.permute.xlu0 %1545 }
 0xfba   :  { %3038 = vrcp.f32 %v1540_v9  ;;  %2903 = vmatpush3.msra.mxu0 %v1546_v10 }
 0xfbb   :  { %2912 = vmatprep.subr.mxu0 %v3082_v34 }
 0xfbd   :  { %v1698_v13 = vpop.permute.xlu0 %1697  ;;  %v1776_v14 = vpop.permute.xlu1 %1775 }
 0xfc3   :  { %v3037_v33 = vpop.eup %3036 }
 0xfc4   :  { %v1543_v31 = vmul.f32 %v3037_v33, %v3033_v2 }
 0xfc6   :  { %2905 = vmatmul.mubr.msk.f32.vlgmr.msra.gmra.mxu0 %vm369_vm3, %v1543_v31 }
 0xfc7   :  { %v3039_v11 = vpop.eup %3038  ;;  %2913 = vmatpush3.xpose.msk.msra.mxu0 %vm217_vm2, %v1700_v6  ;;  %2914 = vmatprep.mubr.msk.f32.mxu0 %vm3083_vm1, %v3082_v34 }
 0xfc8   :  { %v1544_v12 = vmul.f32 %v3039_v11, %v3035_v4  ;;  %2922 = vmatprep.subr.mxu0 %v3082_v34 }
 0xfca   :  { %2910 = vmatmul.mubr.msk.f32.vlgmr.msra.gmra.mxu1 %vm369_vm3, %v1544_v12  ;;  %2915 = vmatmul.mubr.msk.f32.vlgmr.msra.gmra.mxu0 %vm217_vm2, %v1698_v13 }
 0xfcb   :  { %2918 = vmatpush3.xpose.msk.msra.mxu1 %vm217_vm2, %v1778_v7  ;;  %2919 = vmatprep.mubr.msk.f32.mxu1 %vm3083_vm1, %v3082_v34 }
 0xfcc   :  { %2927 = vmatprep.subr.mxu1 %v3082_v34  ;;  %2924 = vmatprep.mubr.msk.f32.mxu0 %vm3083_vm1, %v3082_v34 }
 0xfce   :  { %2920 = vmatmul.mubr.msk.f32.vlgmr.msra.gmra.mxu1 %vm217_vm2, %v1776_v14  ;;  %v2669_v14 = vld [vmem:[%s3645_s11 + $0x30] sm:$0xff] }
 0xfcf   :  { %2929 = vmatprep.mubr.msk.f32.mxu1 %vm3083_vm1, %v3082_v34 }
0x1086   :  { %v3493_v15 = vpop.f32.mrf.mxu0 }
0x1088   :  { %v2906_v16 = vpop.f32.mrf.mxu0 }
0x1089   :  { %v2667_v16 = vld [vmem:[%s3645_s11 + $0x20] sm:$0xff] }
0x108a   :  { %v3495_v17 = vpop.f32.mrf.mxu1  ;;  %v1771_v18 = vpop.f32.mrf.mxu0 }
0x108b   :  { %v1772_v19 = vadd.f32 %v3254_v42, %v1771_v18 }
0x108c   :  { %v2911_v20 = vpop.f32.mrf.mxu1  ;;  %v2916_v21 = vpop.f32.mrf.mxu0 }
0x108d   :  { %v1853_v22 = vsel %vm369_vm3, %v1772_v19, -inf }
0x108e   :  { %1854 = vmax.xlane.f32.xlu0 %v1853_v22  ;;  %v1849_v23 = vpop.f32.mrf.mxu1 }
0x108f   :  { %v1850_v24 = vadd.f32 %v3260_v46, %v1849_v23 }
0x1090   :  { %v2921_v25 = vpop.f32.mrf.mxu1 }
0x1091   :  { %v1856_v26 = vsel %vm369_vm3, %v1850_v24, -inf }
0x1092   :  { %1857 = vmax.xlane.f32.xlu1 %v1856_v26  ;;  %v2666_v26 = vld [vmem:[%s3644_s10 + $0x1] ss:$0 sm:$0xff] }
0x10a3   :  { %1951 = vrot.lane.b32.xlu1 %v3437_v39, %s3088_s23 }
0x1117   :  { %v1855_v27 = vpop.xlane.xlu0 %1854 }
0x1118   :  { %v1859_v28 = vsub.f32 %v1772_v19, %v1855_v27 }
0x111a   :  { %v1861_v29 = vmul.f32 1.442695, %v1859_v28 }
0x111b   :  { %v1858_v30 = vpop.xlane.xlu1 %1857 }
0x111c   :  { %3040 = vpow2.f32 %v1861_v29  ;;  %v1860_v42 = vsub.f32 %v1850_v24, %v1858_v30  ;;  %v2665_v24 = vld [vmem:[%s3643_s9 + $0x1] ss:$0 sm:$0xff] }
0x111e   :  { %v1863_v32 = vmul.f32 1.442695, %v1860_v42 }
0x111f   :  { %v1952_v35 = vpop.permute.xlu1 %1951 }
0x1120   :  { %3042 = vpow2.f32 %v1863_v32  ;;  %2928 = vmatpush3.msra.mxu1 %v1952_v35  ;;  %v2682_v35 = vld [vmem:[%s3647_s13 + $0x78] sm:$0xff] }
0x1129   :  { %v3041_v36 = vpop.eup %3040 }
0x112a   :  { %v1865_v46 = vsel %vm369_vm3, %v3041_v36, 0.0 }
0x112b   :  { %1866 = vadd.xlane.f32.xlu0 %v1865_v46  ;;  %v2680_v46 = vld [vmem:[%s3647_s13 + $0x68] sm:$0xff] }
0x112d   :  { %v3043_v37 = vpop.eup %3042 }
0x112e   :  { %v1868_v38 = vsel %vm369_vm3, %v3043_v37, 0.0 }
0x112f   :  { %1869 = vadd.xlane.f32.xlu0 %v1868_v38  ;;  %v2678_v38 = vld [vmem:[%s3647_s13 + $0x58] sm:$0xff] }
0x1145   :  { %1875 = vrot.lane.b32.xlu0 %v3439_v48, %s3088_s23  ;;  %v2657_v48 = vld [vmem:[%s3641_s7 + $0x30] sm:$0xff]  ;;  %s2595_s23 = sshll.u32 %s3090_s2, 4  ;;  %s2596_s23 = int_to_ptr.vmem [resolvable:$true] %s2595_s23 }
0x1146   :  { %s3060_s24 = scalar_lea.vmem %s2596_s23, 32  ;;  %p3065_p1 = scmp.lt.s32.totalorder %s2596_s23, %s2596_s23 }
0x1147   :  { %p3061_p0 = scmp.ne.s32.totalorder %s2596_s23, %s3060_s24  ;;  %p3066_p2 = scmp.lt.s32.totalorder %s3060_s24, %s3060_s24 }
0x1149   :  { %p3067_p3 = por %p3066_p2, %p3065_p1 }
0x114b   :  { %p3068_p4 = pnand %p3067_p3, %p3061_p0 }
0x11b4   :  { %v1867_v40 = vpop.xlane.xlu0 %1866 }
0x11b5   :  { %3044 = vrcp.f32 %v1867_v40  ;;  %v2677_v40 = vld [vmem:[%s3647_s13 + $0x50] sm:$0xff] }
0x11b8   :  { %v1870_v44 = vpop.xlane.xlu0 %1869 }
0x11b9   :  { %3046 = vrcp.f32 %v1870_v44  ;;  %v2676_v44 = vld [vmem:[%s3647_s13 + $0x48] sm:$0xff] }
0x11bc   :  { %v1876_v45 = vpop.permute.xlu0 %1875 }
0x11bd   :  { %2923 = vmatpush3.msra.mxu0 %v1876_v45  ;;  %v2675_v45 = vld [vmem:[%s3647_s13 + $0x40] sm:$0xff] }
0x11be   :  { %2932 = vmatprep.subr.mxu0 %v2658_v51 }
0x11c2   :  { %v3045_v39 = vpop.eup %3044 }
0x11c3   :  { %v1873_v47 = vmul.f32 %v3045_v39, %v3041_v36  ;;  %v2681_v36 = vld [vmem:[%s3647_s13 + $0x70] sm:$0xff]  ;;  %v2672_v39 = vld [vmem:[%s3646_s12 + $0x1] ss:$0 sm:$0xff] }
0x11c5   :  { %2925 = vmatmul.mubr.msk.f32.vlgmr.msra.gmra.mxu0 %vm369_vm3, %v1873_v47 }
0x11c6   :  { %v3047_v49 = vpop.eup %3046  ;;  %2933 = vmatpush3.msra.mxu0 %v2658_v51 }
0x11c7   :  { %v1874_v50 = vmul.f32 %v3047_v49, %v3043_v37  ;;  %2934 = vmatprep.subr.mxu0 %v2657_v48  ;;  %v2679_v37 = vld [vmem:[%s3647_s13 + $0x60] sm:$0xff] }
0x11c8   :  { %2935 = vmatpush3.msra.mxu0 %v2657_v48 }
0x11c9   :  { %2930 = vmatmul.mubr.msk.f32.vlgmr.msra.gmra.mxu1 %vm369_vm3, %v1874_v50  ;;  %2936 = vmatprep.subr.mxu0 %v2656_v52 }
0x11ca   :  { %2937 = vmatpush3.msra.mxu0 %v2656_v52 }
0x11cb   :  { %2938 = vmatprep.subr.mxu0 %v2655_v53 }
0x11cc   :  { %2939 = vmatpush3.msra.mxu0 %v2655_v53 }
0x11cd   :  { %2954 = vmatprep.subr.mxu0 %v2682_v35 }
0x1285   :  { %v1947_v54 = vpop.f32.mrf.mxu0 }
0x1286   :  { %2029 = vrot.lane.b32.xlu1 %v1947_v54, %s3089_s0 }
0x1287   :  { %v2926_v55 = vpop.f32.mrf.mxu0 }
0x1289   :  { %v2023_v56 = vpop.f32.mrf.mxu1 }
0x128a   :  { %2031 = vrot.lane.b32.xlu1 %v2023_v56, %s3089_s0 }
0x128b   :  { %v2931_v57 = vpop.f32.mrf.mxu1 }
0x12f8   :  { %v2030_v58 = vpop.permute.xlu1 %2029 }
0x12f9   :  { %v2035_v59 = vsel %vm217_vm2, %v3493_v15, %v2030_v58  ;;  %v2668_v15 = vld [vmem:[%s3645_s11 + $0x28] sm:$0xff] }
0x12fa   :  { %2940 = vmatprep.mubr.msk.f32.mxu0 %vm64_vm0, %v2035_v59 }
0x12fc   :  { %v2032_v60 = vpop.permute.xlu1 %2031 }
0x12fd   :  { %v2036_v61 = vsel %vm217_vm2, %v3495_v17, %v2032_v60 }
0x12fe   :  { %2941 = vmatmul.mubr.msk.f32.vlgmr.msra.gmra.mxu0 %vm64_vm0, %v2036_v61 }
0x12ff   :  { %2955 = vmatpush3.msra.mxu0 %v2682_v35 }
0x1300   :  { %2956 = vmatprep.subr.mxu0 %v2681_v36 }
0x1301   :  { %2957 = vmatpush3.msra.mxu0 %v2681_v36 }
0x1302   :  { %2958 = vmatprep.subr.mxu0 %v2680_v46 }
0x1303   :  { %2959 = vmatpush3.msra.mxu0 %v2680_v46 }
0x1304   :  { %2960 = vmatprep.subr.mxu0 %v2679_v37 }
0x1305   :  { %2961 = vmatpush3.msra.mxu0 %v2679_v37 }
0x1306   :  { %2962 = vmatprep.subr.mxu0 %v2678_v38 }
0x1307   :  { %2963 = vmatpush3.msra.mxu0 %v2678_v38  ;;  %v2514_v38 = vld [vmem:[%s3651_s17 + $0x18] sm:$0xff] }
0x1308   :  { %2964 = vmatprep.subr.mxu0 %v2677_v40 }
0x1309   :  { %2965 = vmatpush3.msra.mxu0 %v2677_v40  ;;  %v2513_v40 = vld [vmem:[%s3651_s17 + $0x10] sm:$0xff] }
0x130a   :  { %2966 = vmatprep.subr.mxu0 %v2676_v44 }
0x130b   :  { %2967 = vmatpush3.msra.mxu0 %v2676_v44  ;;  %v2512_v44 = vld [vmem:[%s3651_s17 + $0x8] sm:$0xff] }
0x130c   :  { %2968 = vmatprep.subr.mxu0 %v2675_v45 }
0x130d   :  { %2969 = vmatpush3.msra.mxu0 %v2675_v45  ;;  %v2511_v45 = vld [vmem:[%s3651_s17] sm:$0xff] }
0x13be   :  { %v2942_v63 = vpop.f32.mrf.mxu0 }
0x13bf   :  { %v2128_v0 = vadd.f32 %v2942_v63, %v2660_v62 }
0x13c0   :  { %v2122_v1 = vpop.f32.mrf.mxu0 }
0x13c1   :  { %v2123_v2 = vadd.f32 %v2660_v62, %v2122_v1  ;;  %v2132_v3 = vadd.f32 %v2128_v0, %v3426_v43 }
0x13c3   :  { %v2140_v4 = vsel %vm64_vm0, %v2132_v3, 0.0  ;;  %v2131_v5 = vadd.f32 %v2123_v2, %v3424_v41  ;;  %v2670_v41 = vld [vmem:[%s3645_s11 + $0x38] sm:$0xff]  ;;  %s3660_s11 = sld [smem:[#allocation7_spill]] }
0x13c4   :  { %2141 = vadd.xlane.f32.xlu1 %v2140_v4  ;;  %2943 = vmatprep.subr.mxu1 %v2670_v41 }
0x13c5   :  { %v2137_v6 = vsel %vm64_vm0, %v2131_v5, 0.0  ;;  %2944 = vmatpush3.msra.mxu1 %v2670_v41 }
0x13c6   :  { %2138 = vadd.xlane.f32.xlu0 %v2137_v6  ;;  %2945 = vmatprep.subr.mxu1 %v2669_v14 }
0x13c7   :  { %2946 = vmatpush3.msra.mxu1 %v2669_v14 }
0x13c8   :  { %2947 = vmatprep.subr.mxu1 %v2668_v15 }
0x13c9   :  { %2948 = vmatpush3.msra.mxu1 %v2668_v15  ;;  %v2437_v37 = vld [vmem:[%s3660_s11] sm:$0x3] }
0x13ca   :  { %2949 = vmatprep.subr.mxu1 %v2667_v16 }
0x13cb   :  { %2950 = vmatpush3.msra.mxu1 %v2667_v16 }
0x13cc   :  { %2973 = vmatprep.subr.mxu1 %v3082_v34 }
0x144d   :  { %v2142_v7 = vpop.xlane.xlu1 %2141 }
0x144e   :  { %v2144_v8 = vmul.f32 0.03125, %v2142_v7 }
0x144f   :  { %v2139_v9 = vpop.xlane.xlu0 %2138 }
0x1450   :  { %v2143_v10 = vmul.f32 0.03125, %v2139_v9  ;;  %v2146_v33 = vsub.f32 %v2132_v3, %v2144_v8 }
0x1452   :  { %v2145_v31 = vsub.f32 %v2131_v5, %v2143_v10  ;;  %v2148_v13 = vmul.f32 %v2146_v33, %v2146_v33  ;;  %v2684_v5 = vld [vmem:[%s3648_s14 + $0x1] ss:$0 sm:$0xff] }
0x1454   :  { %v2147_v11 = vmul.f32 %v2145_v31, %v2145_v31  ;;  %v2152_v43 = vsel %vm64_vm0, %v2148_v13, 0.0 }
0x1456   :  { %v2149_v12 = vsel %vm64_vm0, %v2147_v11, 0.0 }
0x1457   :  { %2150 = vadd.xlane.f32.xlu0 %v2149_v12 }
0x145b   :  { %2153 = vadd.xlane.f32.xlu0 %v2152_v43 }
0x14e0   :  { %v2151_v17 = vpop.xlane.xlu0 %2150 }
0x14e1   :  { %v2155_v18 = vmul.f32 0.03125, %v2151_v17 }
0x14e3   :  { %v2157_v19 = vadd.f32 1e-05, %v2155_v18 }
0x14e4   :  { %v2154_v20 = vpop.xlane.xlu0 %2153 }
0x14e5   :  { %3048 = vrsqrt.f32 %v2157_v19  ;;  %v2156_v21 = vmul.f32 0.03125, %v2154_v20 }
0x14e7   :  { %v2158_v22 = vadd.f32 1e-05, %v2156_v21 }
0x14e9   :  { %3050 = vrsqrt.f32 %v2158_v22 }
0x14f2   :  { %v3049_v23 = vpop.eup %3048 }
0x14f3   :  { %v2161_v25 = vmul.f32 %v3049_v23, %v2145_v31 }
0x14f5   :  { %v2169_v27 = vmul.f32 %v2665_v24, %v2161_v25 }
0x14f6   :  { %v3051_v28 = vpop.eup %3050 }
0x14f7   :  { %v2162_v29 = vmul.f32 %v3051_v28, %v2146_v33  ;;  %v3557_v30 = vadd.f32 %v2666_v26, %v2169_v27  ;;  %v2689_v27 = vld [vmem:[%s3649_s15 + $0x1] ss:$0 sm:$0xff] }
0x14f9   :  { %v2170_v42 = vmul.f32 %v2665_v24, %v2162_v29  ;;  %2951 = vmatprep.mubr.msk.f32.mxu1 %vm64_vm0, %v3557_v30 }
0x14fb   :  { %v2178_v32 = vadd.f32 %v2666_v26, %v2170_v42 }
0x14fd   :  { %2952 = vmatmul.mubr.msk.f32.vlgmr.msra.gmra.mxu1 %vm64_vm0, %v2178_v32 }
0x14fe   :  { %2977 = vmatprep.mubr.msk.f32.mxu1 %vm3083_vm1, %v3082_v34 }
0x15bd   :  { %v2953_v47 = vpop.f32.mrf.mxu1 }
0x15be   :  { %v2270_v49 = vadd.f32 %v2953_v47, %v2672_v39 }
0x15bf   :  { %v2264_v50 = vpop.f32.mrf.mxu1 }
0x15c0   :  { %v2274_v51 = vmul.f32 %v2270_v49, %v2270_v49  ;;  %v2265_v48 = vadd.f32 %v2672_v39, %v2264_v50 }
0x15c2   :  { %v2276_v52 = vmul.f32 %v2274_v51, %v2270_v49  ;;  %v2273_v53 = vmul.f32 %v2265_v48, %v2265_v48 }
0x15c4   :  { %v2278_v54 = vmul.f32 0.044715, %v2276_v52  ;;  %v2275_v55 = vmul.f32 %v2273_v53, %v2265_v48 }
0x15c6   :  { %v2280_v56 = vadd.f32 %v2278_v54, %v2270_v49  ;;  %v2277_v57 = vmul.f32 0.044715, %v2275_v55 }
0x15c8   :  { %v2282_v58 = vmul.f32 0.7978846, %v2280_v56  ;;  %v2279_v59 = vadd.f32 %v2277_v57, %v2265_v48 }
0x15ca   :  { %3052 = vtanh.f32 %v2282_v58  ;;  %v2281_v60 = vmul.f32 0.7978846, %v2279_v59 }
0x15cc   :  { %3054 = vtanh.f32 %v2281_v60 }
0x15d7   :  { %v3053_v61 = vpop.eup %3052 }
0x15d8   :  { %v2286_v62 = vadd.f32 1.0, %v3053_v61 }
0x15d9   :  { %v3055_v63 = vpop.eup %3054 }
0x15da   :  { %v2285_v0 = vadd.f32 1.0, %v3055_v63  ;;  %v2288_v1 = vmul.f32 0.5, %v2286_v62 }
0x15dc   :  { %v2287_v2 = vmul.f32 0.5, %v2285_v0  ;;  %v2290_v4 = vmul.f32 %v2288_v1, %v2270_v49 }
0x15de   :  { %v2289_v3 = vmul.f32 %v2287_v2, %v2265_v48 }
0x15e0   :  { %2970 = vmatprep.mubr.msk.f32.mxu0 %vm1147_vm4, %v2289_v3 }
0x15e1   :  { %2971 = vmatmul.mubr.msk.f32.vlgmr.msra.gmra.mxu0 %vm1147_vm4, %v2290_v4 }
0x16a1   :  { %v2972_v6 = vpop.f32.mrf.mxu0 }
0x16a2   :  { %v2386_v7 = vadd.f32 %v2972_v6, %v2684_v5 }
0x16a3   :  { %v2380_v8 = vpop.f32.mrf.mxu0 }
0x16a4   :  { %v2381_v9 = vadd.f32 %v2684_v5, %v2380_v8  ;;  %v2390_v10 = vadd.f32 %v2386_v7, %v2178_v32 }
0x16a6   :  { %v2398_v33 = vsel %vm64_vm0, %v2390_v10, 0.0  ;;  %v2389_v31 = vadd.f32 %v2381_v9, %v3557_v30  ;;  %v2690_v30 = vld [vmem:[%s3650_s16 + $0x1] ss:$0 sm:$0xff] }
0x16a7   :  { %2399 = vadd.xlane.f32.xlu0 %v2398_v33 }
0x16a8   :  { %v2395_v11 = vsel %vm64_vm0, %v2389_v31, 0.0 }
0x16a9   :  { %2396 = vadd.xlane.f32.xlu1 %v2395_v11 }
0x1730   :  { %v2400_v12 = vpop.xlane.xlu0 %2399 }
0x1731   :  { %v2402_v13 = vmul.f32 0.03125, %v2400_v12 }
0x1732   :  { %v2397_v43 = vpop.xlane.xlu1 %2396 }
0x1733   :  { %v2404_v41 = vsub.f32 %v2390_v10, %v2402_v13  ;;  %v2401_v14 = vmul.f32 0.03125, %v2397_v43 }
0x1735   :  { %v2403_v15 = vsub.f32 %v2389_v31, %v2401_v14  ;;  %v2406_v16 = vmul.f32 %v2404_v41, %v2404_v41 }
0x1737   :  { %v2410_v17 = vsel %vm64_vm0, %v2406_v16, 0.0  ;;  %v2405_v18 = vmul.f32 %v2403_v15, %v2403_v15 }
0x1738   :  { %2411 = vadd.xlane.f32.xlu0 %v2410_v17 }
0x1739   :  { %v2407_v19 = vsel %vm64_vm0, %v2405_v18, 0.0 }
0x173a   :  { %2408 = vadd.xlane.f32.xlu1 %v2407_v19 }
0x17c1   :  { %v2412_v20 = vpop.xlane.xlu0 %2411 }
0x17c2   :  { %v2414_v21 = vmul.f32 0.03125, %v2412_v20 }
0x17c3   :  { %v2409_v22 = vpop.xlane.xlu1 %2408 }
0x17c4   :  { %v2416_v23 = vadd.f32 1e-05, %v2414_v21  ;;  %v2413_v24 = vmul.f32 0.03125, %v2409_v22 }
0x17c6   :  { %3056 = vrsqrt.f32 %v2416_v23  ;;  %v2415_v25 = vadd.f32 1e-05, %v2413_v24 }
0x17c8   :  { %3058 = vrsqrt.f32 %v2415_v25 }
0x17d3   :  { %v3057_v26 = vpop.eup %3056 }
0x17d4   :  { %v2420_v28 = vmul.f32 %v3057_v26, %v2404_v41 }
0x17d5   :  { %v3059_v29 = vpop.eup %3058 }
0x17d6   :  { %v2428_v42 = vmul.f32 %v2689_v27, %v2420_v28  ;;  %v2419_v32 = vmul.f32 %v3059_v29, %v2403_v15 }
0x17d8   :  { %v2436_v35 = vadd.f32 %v2690_v30, %v2428_v42  ;;  %v2427_v36 = vmul.f32 %v2689_v27, %v2419_v32 }
0x17da   :  { %2974 = vmatpush3.msra.mxu1 %v2436_v35  ;;  %v2435_v46 = vadd.f32 %v2690_v30, %v2427_v36 }
0x17db   :  { %2975 = vmatprep.subr.mxu1 %v3082_v34 }
0x17dc   :  { %2976 = vmatpush3.msra.mxu1 %v2435_v46 }
0x17dd   :  { %2978 = vmatmul.mubr.msk.f32.vlgmr.msra.gmra.mxu1 %vm217_vm2, %v2437_v37  ;;  %2980 = vmatprep.subr.mxu1 %v3082_v34 }
0x17de   :  { %2981 = vmatpush3.msra.mxu1 %v2514_v38  ;;  %2988 = vmatprep.mubr.msk.f32.mxu1 %vm3083_vm1, %v3082_v34 }
0x17df   :  { %2982 = vmatprep.subr.mxu1 %v3082_v34 }
0x17e0   :  { %2983 = vmatpush3.msra.mxu1 %v2513_v40 }
0x17e1   :  { %2984 = vmatprep.subr.mxu1 %v3082_v34 }
0x17e2   :  { %2985 = vmatpush3.msra.mxu1 %v2512_v44 }
0x17e3   :  { %2986 = vmatprep.subr.mxu1 %v3082_v34 }
0x17e4   :  { %2987 = vmatpush3.msra.mxu1 %v2511_v45 }
0x189d   :  { %v2507_v39 = vpop.f32.mrf.mxu1 }
0x189e   :  { %2989 = vmatmul.mubr.msk.f32.vlgmr.msra.gmra.mxu1 %vm64_vm0, %v2507_v39 }
0x189f   :  { %v2979_v47 = vpop.f32.mrf.mxu1 }
0x195e   :  { %v2584_v49 = vpop.f32.mrf.mxu1 }
0x195f   :  { %2588 = vst [vmem:[#allocation2] sm:$0x3] %v2584_v49 }
0x1960   :  { %v2990_v50 = vpop.f32.mrf.mxu1 }
0x1961   :  { %3071 = shalt.err (!%p3068_p4)
}
0x1962   :  { %2598 = dma.vmem_to_hbm [thread:$0]  %s2596_s23, 32, %s3652_s18, [#allocation3]  }
0x1963   :  { %3080 = dma.done.wait [#allocation3], 32  }
0x1964   :  { %3081 = vsyncadd [#allocation3], 4294967264 }
0x1965   :  { %2602 = vsyncpa [#allocation3], 1 }

</bundles_post_ra>
